<compile_context>
chip_gen: v7x
topology: tpu7x:2x2x1
jax: 0.10.0
libtpu: 0.0.40
codegen_flags: <defaults>
</compile_context>

<pallas_src>
import jax
import jax.numpy as jnp
from jax.experimental import pallas as pl
from jax.experimental.pallas import tpu as pltpu

# ----------------------------- configuration ---------------------------------
EMBED = 32     # embed_size  (scaled down from 256)
HIDDEN = 32    # hidden_size (scaled down from 512)
VOCAB = 128    # vocab_size  (scaled down from 10000)
CFEAT = 8      # channels of the toy CNN backbone
KSIZE = 3      # conv kernel size
CIN = 3        # RGB input channels


# --------------------------- fused Pallas kernel ------------------------------
def caption_kernel(ids_ref,                                  # ((T-1)*B, 1) int32, time-major ids
                   patchesT_ref, cwT_ref, cbT_ref, poolT_ref, fw_ref, fb_ref,
                   emb_ref, wih_ref, whh_ref, b_ref, wout_ref, bout_ref,
                   logits_ref, hn_ref, cn_ref):
    B, T, V = logits_ref.shape
    H = hn_ref.shape[-1]
    f32, bf16 = jnp.float32, jnp.bfloat16

    # ---- encoder: conv(im2col) + ReLU + GAP + Linear + ReLU, lane-dense transposed layout ----
    # convT: (CFEAT, B*P) -> only 4 fully packed vregs instead of a (B*P, CFEAT) slab.
    convT = jnp.dot(cwT_ref[...], patchesT_ref[...], preferred_element_type=f32)
    convT = jnp.maximum(convT + cbT_ref[...], 0.0)
    # GAP as an MXU matmul against the transposed block-mean matrix (bf16 operands, f32 acc).
    pooledT = jnp.dot(convT.astype(bf16), poolT_ref[...],
                      preferred_element_type=f32)                          # (CFEAT, B)
    # feat = relu(pooled @ fc_w + fc_b); the pooled transpose is folded into the MXU via
    # dot_general (lhs contraction on dim 0) -> no XLU transpose.
    feat = jax.lax.dot_general(pooledT.astype(bf16), fw_ref[...],
                               (((0,), (0,)), ((), ())),
                               preferred_element_type=f32) + fb_ref[...]   # (B, EMBED)
    feat = jnp.maximum(feat, 0.0)

    # ---- embedding lookup: ONE one-hot matmul (hoisted out of the serial loop) ----
    ids = ids_ref[...]                                                     # ((T-1)*B, 1) int32
    onehot = (ids == jax.lax.broadcasted_iota(jnp.int32, ((T - 1) * B, V), 1)).astype(bf16)
    emb_rows = jnp.dot(onehot, emb_ref[...], preferred_element_type=f32)   # ((T-1)*B, EMBED)

    # ---- input-side LSTM projection for ALL timesteps at once (off the recurrence) ----
    # Row order is time-major: rows [t*B : (t+1)*B] are timestep t (t=0 is the feature step).
    x_all = jnp.concatenate([feat, emb_rows], axis=0).astype(bf16)         # (T*B, EMBED)
    xproj = jnp.dot(x_all, wih_ref[...], preferred_element_type=f32) + b_ref[...]  # (T*B, 4H)

    # ---- decoder: only the recurrence lives inside the (statically unrolled) loop ----
    whh = whh_ref[...]                                                     # (H, 4H) bf16
    h = jnp.zeros((B, H), f32)
    c = jnp.zeros((B, H), f32)
    hs = []
    for t in range(T):                               # static unroll; all indices static
        pre = xproj[t * B:(t + 1) * B, :] + jnp.dot(
            h.astype(bf16), whh, preferred_element_type=f32)               # (B, 4H=128)
        # PyTorch LSTM gate order: input, forget, cell(g), output — static 32-lane slices.
        i_g = jax.nn.sigmoid(pre[:, 0 * H:1 * H])
        f_g = jax.nn.sigmoid(pre[:, 1 * H:2 * H])
        g_g = jnp.tanh(pre[:, 2 * H:3 * H])
        o_g = jax.nn.sigmoid(pre[:, 3 * H:4 * H])
        c = f_g * c + i_g * g_g
        h = o_g * jnp.tanh(c)
        hs.append(h)

    # ---- vocab projection batched over all timesteps; ONE full-tile lane-dense store ----
    h_bt = jnp.stack(hs, axis=1).reshape(B * T, H).astype(bf16)            # row = b*T + t
    logits = jnp.dot(h_bt, wout_ref[...], preferred_element_type=f32) + bout_ref[...]
    logits_ref[...] = logits.reshape(B, T, V).astype(logits_ref.dtype)     # (B, T, 128)

    hn_ref[...] = h
    cn_ref[...] = c


def caption_pallas(ids_flat, patches_T, pool_T, params, *, B, T):
    in_arrays = (ids_flat, patches_T,
                 params["conv_wT"], params["conv_bT"], pool_T,
                 params["fc_w"], params["fc_b"],
                 params["embed"], params["w_ih"], params["w_hh"], params["b"],
                 params["w_out"], params["b_out"])

    def full_spec(shape):
        return pl.BlockSpec(shape, lambda i, n=len(shape): (0,) * n)

    return pl.pallas_call(
        caption_kernel,
        out_shape=(jax.ShapeDtypeStruct((B, T, VOCAB), jnp.float32),
                   jax.ShapeDtypeStruct((B, HIDDEN), jnp.float32),
                   jax.ShapeDtypeStruct((B, HIDDEN), jnp.float32)),
        grid=(1,),                                   # single launch: whole model in-kernel
        in_specs=[full_spec(a.shape) for a in in_arrays],
        out_specs=(full_spec((B, T, VOCAB)),
                   full_spec((B, HIDDEN)),
                   full_spec((B, HIDDEN))),
        compiler_params=pltpu.CompilerParams(dimension_semantics=("arbitrary",)),
    )(*in_arrays)


# ------------------------------ JAX glue --------------------------------------
def im2col_3x3_same(x):
    # x: NCHW [B, C, H, W] -> patches [B, H*W, 9*C] (SAME padding, stride 1)
    B, C, H, W = x.shape
    xp = jnp.pad(x, ((0, 0), (0, 0), (1, 1), (1, 1)))
    cols = []
    for dh in range(KSIZE):
        for dw in range(KSIZE):
            cols.append(xp[:, :, dh:dh + H, dw:dw + W])
    p = jnp.stack(cols, axis=1)                       # (B, 9, C, H, W)
    p = p.transpose(0, 3, 4, 1, 2).reshape(B, H * W, KSIZE * KSIZE * C)
    return p


def init_params(key):
    ks = jax.random.split(key, 8)
    s = 0.05
    f32, bf16 = jnp.float32, jnp.bfloat16
    return {
        # MXU operand weights in bf16 (f32 accumulation in-kernel); biases in f32.
        "conv_wT": (s * jax.random.normal(ks[0], (CFEAT, KSIZE * KSIZE * CIN), f32)).astype(bf16),
        "conv_bT": s * jax.random.normal(ks[1], (CFEAT, 1), f32),
        "fc_w":    (s * jax.random.normal(ks[2], (CFEAT, EMBED), f32)).astype(bf16),
        "fc_b":    s * jax.random.normal(ks[3], (1, EMBED), f32),
        "embed":   (s * jax.random.normal(ks[4], (VOCAB, EMBED), f32)).astype(bf16),
        "w_ih":    (s * jax.random.normal(ks[5], (EMBED, 4 * HIDDEN), f32)).astype(bf16),
        "w_hh":    (s * jax.random.normal(ks[6], (HIDDEN, 4 * HIDDEN), f32)).astype(bf16),
        "b":       jnp.zeros((1, 4 * HIDDEN), f32),   # b_ih + b_hh combined
        "w_out":   (s * jax.random.normal(ks[7], (HIDDEN, VOCAB), f32)).astype(bf16),
        "b_out":   jnp.zeros((1, VOCAB), f32),
    }


def caption_model_forward(params, images, captions):
    B, _, Himg, Wimg = images.shape
    P = Himg * Wimg
    T = captions.shape[1]

    # im2col, transposed so the long B*P dimension is lane-dense inside the kernel.
    patches = im2col_3x3_same(images).reshape(B * P, KSIZE * KSIZE * CIN)
    patches_T = patches.T.astype(jnp.bfloat16)                        # (9*CIN, B*P)
    # transposed block-mean matrix: pooledT[:, b] = mean over image b's P conv columns
    pool_T = (jnp.repeat(jnp.eye(B, dtype=jnp.float32), P, axis=0) / float(P)).astype(jnp.bfloat16)

    # teacher-forced token ids, time-major flat: row (t*B + b) = captions[b, t], t = 0..T-2
    ids_flat = captions[:, :T - 1].astype(jnp.int32).T.reshape((T - 1) * B, 1)

    logits, h_n, c_n = caption_pallas(ids_flat, patches_T, pool_T, params, B=B, T=T)
    # outputs: [B, seq_length, VOCAB]; hidden: (num_layers=1, B, H) for both h and c
    hidden = (h_n[None, :, :], c_n[None, :, :])
    return logits, hidden


# --------------------------------- main ---------------------------------------
if __name__ == "__main__":
    key = jax.random.PRNGKey(0)
    k_img, k_cap, k_par = jax.random.split(key, 3)

    B, Himg, Wimg, T = 2, 16, 16, 8
    images = jax.random.normal(k_img, (B, CIN, Himg, Wimg), jnp.float32)     # NCHW
    captions = jax.random.randint(k_cap, (B, T), 0, VOCAB, jnp.int32)        # [B, seq_len]
    params = init_params(k_par)

    fwd = jax.jit(caption_model_forward)
    outputs, (h_n, c_n) = fwd(params, images, captions)
    jax.block_until_ready(outputs)
    jax.block_until_ready(h_n)
    jax.block_until_ready(c_n)

    assert outputs.shape == (B, T, VOCAB)
    assert h_n.shape == (1, B, HIDDEN) and c_n.shape == (1, B, HIDDEN)
    assert bool(jnp.isfinite(outputs).all())
    print("KERNEL_OK")
</pallas_src>

<mosaic_0001>
module attributes {stable_mosaic.version = 11 : i64} {
  func.func @caption_kernel(%arg0: i32, %arg1: memref<14x1xi32, #tpu.memory_space<vmem>>, %arg2: memref<27x512xbf16, #tpu.memory_space<vmem>>, %arg3: memref<8x27xbf16, #tpu.memory_space<vmem>>, %arg4: memref<8x1xf32, #tpu.memory_space<vmem>>, %arg5: memref<512x2xbf16, #tpu.memory_space<vmem>>, %arg6: memref<8x32xbf16, #tpu.memory_space<vmem>>, %arg7: memref<1x32xf32, #tpu.memory_space<vmem>>, %arg8: memref<128x32xbf16, #tpu.memory_space<vmem>>, %arg9: memref<32x128xbf16, #tpu.memory_space<vmem>>, %arg10: memref<32x128xbf16, #tpu.memory_space<vmem>>, %arg11: memref<1x128xf32, #tpu.memory_space<vmem>>, %arg12: memref<32x128xbf16, #tpu.memory_space<vmem>>, %arg13: memref<1x128xf32, #tpu.memory_space<vmem>>, %arg14: memref<2x8x128xf32, #tpu.memory_space<vmem>>, %arg15: memref<2x32xf32, #tpu.memory_space<vmem>>, %arg16: memref<2x32xf32, #tpu.memory_space<vmem>>) attributes {dimension_semantics = [#tpu.dimension_semantics<arbitrary>], iteration_bounds = array<i64: 1>, scalar_prefetch = 0 : i64, scratch_operands = 0 : i64, tpu.core_type = #tpu.core_type<tc>, window_params = [{pipeline_mode = #tpu.pipeline_mode<synchronous>, transform_indices = @transform_0, window_bounds = array<i64: 14, 1>}, {pipeline_mode = #tpu.pipeline_mode<synchronous>, transform_indices = @transform_1, window_bounds = array<i64: 27, 512>}, {pipeline_mode = #tpu.pipeline_mode<synchronous>, transform_indices = @transform_2, window_bounds = array<i64: 8, 27>}, {pipeline_mode = #tpu.pipeline_mode<synchronous>, transform_indices = @transform_3, window_bounds = array<i64: 8, 1>}, {pipeline_mode = #tpu.pipeline_mode<synchronous>, transform_indices = @transform_4, window_bounds = array<i64: 512, 2>}, {pipeline_mode = #tpu.pipeline_mode<synchronous>, transform_indices = @transform_5, window_bounds = array<i64: 8, 32>}, {pipeline_mode = #tpu.pipeline_mode<synchronous>, transform_indices = @transform_6, window_bounds = array<i64: 1, 32>}, {pipeline_mode = #tpu.pipeline_mode<synchronous>, transform_indices = @transform_7, window_bounds = array<i64: 128, 32>}, {pipeline_mode = #tpu.pipeline_mode<synchronous>, transform_indices = @transform_8, window_bounds = array<i64: 32, 128>}, {pipeline_mode = #tpu.pipeline_mode<synchronous>, transform_indices = @transform_9, window_bounds = array<i64: 32, 128>}, {pipeline_mode = #tpu.pipeline_mode<synchronous>, transform_indices = @transform_10, window_bounds = array<i64: 1, 128>}, {pipeline_mode = #tpu.pipeline_mode<synchronous>, transform_indices = @transform_11, window_bounds = array<i64: 32, 128>}, {pipeline_mode = #tpu.pipeline_mode<synchronous>, transform_indices = @transform_12, window_bounds = array<i64: 1, 128>}, {pipeline_mode = #tpu.pipeline_mode<synchronous>, transform_indices = @transform_13, window_bounds = array<i64: 2, 8, 128>}, {pipeline_mode = #tpu.pipeline_mode<synchronous>, transform_indices = @transform_14, window_bounds = array<i64: 2, 32>}, {pipeline_mode = #tpu.pipeline_mode<synchronous>, transform_indices = @transform_15, window_bounds = array<i64: 2, 32>}]} {
    %c0 = arith.constant 0 : index
    %c0_0 = arith.constant 0 : index
    %0 = vector.load %arg3[%c0, %c0_0] : memref<8x27xbf16, #tpu.memory_space<vmem>>, vector<8x27xbf16>
    %c0_1 = arith.constant 0 : index
    %c0_2 = arith.constant 0 : index
    %1 = vector.load %arg2[%c0_1, %c0_2] : memref<27x512xbf16, #tpu.memory_space<vmem>>, vector<27x512xbf16>
    %cst = arith.constant dense<0.000000e+00> : vector<8x512xf32>
    %2 = tpu.matmul %0, %1, %cst {dimension_numbers = #tpu.dot_dimension_numbers<[1], [0], [0], [1], [0, 0, 1, 1], [], []>} : vector<8x27xbf16>, vector<27x512xbf16>, vector<8x512xf32> -> vector<8x512xf32>
    %c0_3 = arith.constant 0 : index
    %c0_4 = arith.constant 0 : index
    %3 = vector.load %arg4[%c0_3, %c0_4] : memref<8x1xf32, #tpu.memory_space<vmem>>, vector<8x1xf32>
    %4 = vector.broadcast %3 : vector<8x1xf32> to vector<8x512xf32>
    %5 = arith.addf %2, %4 : vector<8x512xf32>
    %cst_5 = arith.constant 0.000000e+00 : f32
    %6 = vector.broadcast %cst_5 : f32 to vector<8x512xf32>
    %7 = arith.maximumf %5, %6 : vector<8x512xf32>
    %8 = arith.truncf %7 : vector<8x512xf32> to vector<8x512xbf16>
    %c0_6 = arith.constant 0 : index
    %c0_7 = arith.constant 0 : index
    %9 = vector.load %arg5[%c0_6, %c0_7] : memref<512x2xbf16, #tpu.memory_space<vmem>>, vector<512x2xbf16>
    %cst_8 = arith.constant dense<0.000000e+00> : vector<8x2xf32>
    %10 = tpu.matmul %8, %9, %cst_8 {dimension_numbers = #tpu.dot_dimension_numbers<[1], [0], [0], [1], [0, 0, 1, 1], [], []>} : vector<8x512xbf16>, vector<512x2xbf16>, vector<8x2xf32> -> vector<8x2xf32>
    %11 = arith.truncf %10 : vector<8x2xf32> to vector<8x2xbf16>
    %c0_9 = arith.constant 0 : index
    %c0_10 = arith.constant 0 : index
    %12 = vector.load %arg6[%c0_9, %c0_10] : memref<8x32xbf16, #tpu.memory_space<vmem>>, vector<8x32xbf16>
    %cst_11 = arith.constant dense<0.000000e+00> : vector<2x32xf32>
    %13 = tpu.matmul %11, %12, %cst_11 {dimension_numbers = #tpu.dot_dimension_numbers<[0], [0], [1], [1], [0, 1, 1, 1], [], []>} : vector<8x2xbf16>, vector<8x32xbf16>, vector<2x32xf32> -> vector<2x32xf32>
    %c0_12 = arith.constant 0 : index
    %c0_13 = arith.constant 0 : index
    %14 = vector.load %arg7[%c0_12, %c0_13] : memref<1x32xf32, #tpu.memory_space<vmem>>, vector<1x32xf32>
    %15 = vector.broadcast %14 : vector<1x32xf32> to vector<2x32xf32>
    %16 = arith.addf %13, %15 : vector<2x32xf32>
    %cst_14 = arith.constant 0.000000e+00 : f32
    %17 = vector.broadcast %cst_14 : f32 to vector<2x32xf32>
    %18 = arith.maximumf %16, %17 : vector<2x32xf32>
    %c0_15 = arith.constant 0 : index
    %c0_16 = arith.constant 0 : index
    %19 = vector.load %arg1[%c0_15, %c0_16] : memref<14x1xi32, #tpu.memory_space<vmem>>, vector<14x1xi32>
    %20 = tpu.iota {dimensions = array<i32: 1>} : vector<14x128xi32>
    %21 = vector.broadcast %19 : vector<14x1xi32> to vector<14x128xi32>
    %22 = arith.cmpi eq, %21, %20 : vector<14x128xi32>
    %23 = arith.extui %22 : vector<14x128xi1> to vector<14x128xi32>
    %24 = arith.sitofp %23 : vector<14x128xi32> to vector<14x128xf32>
    %25 = arith.truncf %24 : vector<14x128xf32> to vector<14x128xbf16>
    %c0_17 = arith.constant 0 : index
    %c0_18 = arith.constant 0 : index
    %26 = vector.load %arg8[%c0_17, %c0_18] : memref<128x32xbf16, #tpu.memory_space<vmem>>, vector<128x32xbf16>
    %cst_19 = arith.constant dense<0.000000e+00> : vector<14x32xf32>
    %27 = tpu.matmul %25, %26, %cst_19 {dimension_numbers = #tpu.dot_dimension_numbers<[1], [0], [0], [1], [0, 0, 1, 1], [], []>} : vector<14x128xbf16>, vector<128x32xbf16>, vector<14x32xf32> -> vector<14x32xf32>
    %28 = tpu.concatenate %18, %27 in 0 : vector<2x32xf32>, vector<14x32xf32> -> vector<16x32xf32>
    %29 = arith.truncf %28 : vector<16x32xf32> to vector<16x32xbf16>
    %c0_20 = arith.constant 0 : index
    %c0_21 = arith.constant 0 : index
    %30 = vector.load %arg9[%c0_20, %c0_21] : memref<32x128xbf16, #tpu.memory_space<vmem>>, vector<32x128xbf16>
    %cst_22 = arith.constant dense<0.000000e+00> : vector<16x128xf32>
    %31 = tpu.matmul %29, %30, %cst_22 {dimension_numbers = #tpu.dot_dimension_numbers<[1], [0], [0], [1], [0, 0, 1, 1], [], []>} : vector<16x32xbf16>, vector<32x128xbf16>, vector<16x128xf32> -> vector<16x128xf32>
    %c0_23 = arith.constant 0 : index
    %c0_24 = arith.constant 0 : index
    %32 = vector.load %arg11[%c0_23, %c0_24] : memref<1x128xf32, #tpu.memory_space<vmem>>, vector<1x128xf32>
    %33 = vector.broadcast %32 : vector<1x128xf32> to vector<16x128xf32>
    %34 = arith.addf %31, %33 : vector<16x128xf32>
    %c0_25 = arith.constant 0 : index
    %c0_26 = arith.constant 0 : index
    %35 = vector.load %arg10[%c0_25, %c0_26] : memref<32x128xbf16, #tpu.memory_space<vmem>>, vector<32x128xbf16>
    %cst_27 = arith.constant 0.000000e+00 : f32
    %36 = vector.broadcast %cst_27 : f32 to vector<2x32xf32>
    %cst_28 = arith.constant 0.000000e+00 : f32
    %37 = vector.broadcast %cst_28 : f32 to vector<2x32xf32>
    %38 = vector.extract_strided_slice %34 {offsets = [0, 0], sizes = [2, 128], strides = [1, 1]} : vector<16x128xf32> to vector<2x128xf32>
    %39 = arith.truncf %36 : vector<2x32xf32> to vector<2x32xbf16>
    %cst_29 = arith.constant dense<0.000000e+00> : vector<2x128xf32>
    %40 = tpu.matmul %39, %35, %cst_29 {dimension_numbers = #tpu.dot_dimension_numbers<[1], [0], [0], [1], [0, 0, 1, 1], [], []>} : vector<2x32xbf16>, vector<32x128xbf16>, vector<2x128xf32> -> vector<2x128xf32>
    %41 = arith.addf %38, %40 : vector<2x128xf32>
    %42 = vector.extract_strided_slice %41 {offsets = [0, 0], sizes = [2, 32], strides = [1, 1]} : vector<2x128xf32> to vector<2x32xf32>
    %43 = arith.negf %42 : vector<2x32xf32>
    %44 = math.exp %43 : vector<2x32xf32>
    %cst_30 = arith.constant 1.000000e+00 : f32
    %45 = vector.broadcast %cst_30 : f32 to vector<2x32xf32>
    %46 = arith.addf %45, %44 : vector<2x32xf32>
    %47 = arith.divf %45, %46 : vector<2x32xf32>
    %48 = vector.extract_strided_slice %41 {offsets = [0, 32], sizes = [2, 32], strides = [1, 1]} : vector<2x128xf32> to vector<2x32xf32>
    %49 = arith.negf %48 : vector<2x32xf32>
    %50 = math.exp %49 : vector<2x32xf32>
    %cst_31 = arith.constant 1.000000e+00 : f32
    %51 = vector.broadcast %cst_31 : f32 to vector<2x32xf32>
    %52 = arith.addf %51, %50 : vector<2x32xf32>
    %53 = arith.divf %51, %52 : vector<2x32xf32>
    %54 = vector.extract_strided_slice %41 {offsets = [0, 64], sizes = [2, 32], strides = [1, 1]} : vector<2x128xf32> to vector<2x32xf32>
    %55 = math.tanh %54 : vector<2x32xf32>
    %56 = vector.extract_strided_slice %41 {offsets = [0, 96], sizes = [2, 32], strides = [1, 1]} : vector<2x128xf32> to vector<2x32xf32>
    %57 = arith.negf %56 : vector<2x32xf32>
    %58 = math.exp %57 : vector<2x32xf32>
    %cst_32 = arith.constant 1.000000e+00 : f32
    %59 = vector.broadcast %cst_32 : f32 to vector<2x32xf32>
    %60 = arith.addf %59, %58 : vector<2x32xf32>
    %61 = arith.divf %59, %60 : vector<2x32xf32>
    %62 = arith.mulf %53, %37 : vector<2x32xf32>
    %63 = arith.mulf %47, %55 : vector<2x32xf32>
    %64 = arith.addf %62, %63 : vector<2x32xf32>
    %65 = math.tanh %64 : vector<2x32xf32>
    %66 = arith.mulf %61, %65 : vector<2x32xf32>
    %67 = vector.extract_strided_slice %34 {offsets = [2, 0], sizes = [2, 128], strides = [1, 1]} : vector<16x128xf32> to vector<2x128xf32>
    %68 = arith.truncf %66 : vector<2x32xf32> to vector<2x32xbf16>
    %cst_33 = arith.constant dense<0.000000e+00> : vector<2x128xf32>
    %69 = tpu.matmul %68, %35, %cst_33 {dimension_numbers = #tpu.dot_dimension_numbers<[1], [0], [0], [1], [0, 0, 1, 1], [], []>} : vector<2x32xbf16>, vector<32x128xbf16>, vector<2x128xf32> -> vector<2x128xf32>
    %70 = arith.addf %67, %69 : vector<2x128xf32>
    %71 = vector.extract_strided_slice %70 {offsets = [0, 0], sizes = [2, 32], strides = [1, 1]} : vector<2x128xf32> to vector<2x32xf32>
    %72 = arith.negf %71 : vector<2x32xf32>
    %73 = math.exp %72 : vector<2x32xf32>
    %cst_34 = arith.constant 1.000000e+00 : f32
    %74 = vector.broadcast %cst_34 : f32 to vector<2x32xf32>
    %75 = arith.addf %74, %73 : vector<2x32xf32>
    %76 = arith.divf %74, %75 : vector<2x32xf32>
    %77 = vector.extract_strided_slice %70 {offsets = [0, 32], sizes = [2, 32], strides = [1, 1]} : vector<2x128xf32> to vector<2x32xf32>
    %78 = arith.negf %77 : vector<2x32xf32>
    %79 = math.exp %78 : vector<2x32xf32>
    %cst_35 = arith.constant 1.000000e+00 : f32
    %80 = vector.broadcast %cst_35 : f32 to vector<2x32xf32>
    %81 = arith.addf %80, %79 : vector<2x32xf32>
    %82 = arith.divf %80, %81 : vector<2x32xf32>
    %83 = vector.extract_strided_slice %70 {offsets = [0, 64], sizes = [2, 32], strides = [1, 1]} : vector<2x128xf32> to vector<2x32xf32>
    %84 = math.tanh %83 : vector<2x32xf32>
    %85 = vector.extract_strided_slice %70 {offsets = [0, 96], sizes = [2, 32], strides = [1, 1]} : vector<2x128xf32> to vector<2x32xf32>
    %86 = arith.negf %85 : vector<2x32xf32>
    %87 = math.exp %86 : vector<2x32xf32>
    %cst_36 = arith.constant 1.000000e+00 : f32
    %88 = vector.broadcast %cst_36 : f32 to vector<2x32xf32>
    %89 = arith.addf %88, %87 : vector<2x32xf32>
    %90 = arith.divf %88, %89 : vector<2x32xf32>
    %91 = arith.mulf %82, %64 : vector<2x32xf32>
    %92 = arith.mulf %76, %84 : vector<2x32xf32>
    %93 = arith.addf %91, %92 : vector<2x32xf32>
    %94 = math.tanh %93 : vector<2x32xf32>
    %95 = arith.mulf %90, %94 : vector<2x32xf32>
    %96 = vector.extract_strided_slice %34 {offsets = [4, 0], sizes = [2, 128], strides = [1, 1]} : vector<16x128xf32> to vector<2x128xf32>
    %97 = arith.truncf %95 : vector<2x32xf32> to vector<2x32xbf16>
    %cst_37 = arith.constant dense<0.000000e+00> : vector<2x128xf32>
    %98 = tpu.matmul %97, %35, %cst_37 {dimension_numbers = #tpu.dot_dimension_numbers<[1], [0], [0], [1], [0, 0, 1, 1], [], []>} : vector<2x32xbf16>, vector<32x128xbf16>, vector<2x128xf32> -> vector<2x128xf32>
    %99 = arith.addf %96, %98 : vector<2x128xf32>
    %100 = vector.extract_strided_slice %99 {offsets = [0, 0], sizes = [2, 32], strides = [1, 1]} : vector<2x128xf32> to vector<2x32xf32>
    %101 = arith.negf %100 : vector<2x32xf32>
    %102 = math.exp %101 : vector<2x32xf32>
    %cst_38 = arith.constant 1.000000e+00 : f32
    %103 = vector.broadcast %cst_38 : f32 to vector<2x32xf32>
    %104 = arith.addf %103, %102 : vector<2x32xf32>
    %105 = arith.divf %103, %104 : vector<2x32xf32>
    %106 = vector.extract_strided_slice %99 {offsets = [0, 32], sizes = [2, 32], strides = [1, 1]} : vector<2x128xf32> to vector<2x32xf32>
    %107 = arith.negf %106 : vector<2x32xf32>
    %108 = math.exp %107 : vector<2x32xf32>
    %cst_39 = arith.constant 1.000000e+00 : f32
    %109 = vector.broadcast %cst_39 : f32 to vector<2x32xf32>
    %110 = arith.addf %109, %108 : vector<2x32xf32>
    %111 = arith.divf %109, %110 : vector<2x32xf32>
    %112 = vector.extract_strided_slice %99 {offsets = [0, 64], sizes = [2, 32], strides = [1, 1]} : vector<2x128xf32> to vector<2x32xf32>
    %113 = math.tanh %112 : vector<2x32xf32>
    %114 = vector.extract_strided_slice %99 {offsets = [0, 96], sizes = [2, 32], strides = [1, 1]} : vector<2x128xf32> to vector<2x32xf32>
    %115 = arith.negf %114 : vector<2x32xf32>
    %116 = math.exp %115 : vector<2x32xf32>
    %cst_40 = arith.constant 1.000000e+00 : f32
    %117 = vector.broadcast %cst_40 : f32 to vector<2x32xf32>
    %118 = arith.addf %117, %116 : vector<2x32xf32>
    %119 = arith.divf %117, %118 : vector<2x32xf32>
    %120 = arith.mulf %111, %93 : vector<2x32xf32>
    %121 = arith.mulf %105, %113 : vector<2x32xf32>
    %122 = arith.addf %120, %121 : vector<2x32xf32>
    %123 = math.tanh %122 : vector<2x32xf32>
    %124 = arith.mulf %119, %123 : vector<2x32xf32>
    %125 = vector.extract_strided_slice %34 {offsets = [6, 0], sizes = [2, 128], strides = [1, 1]} : vector<16x128xf32> to vector<2x128xf32>
    %126 = arith.truncf %124 : vector<2x32xf32> to vector<2x32xbf16>
    %cst_41 = arith.constant dense<0.000000e+00> : vector<2x128xf32>
    %127 = tpu.matmul %126, %35, %cst_41 {dimension_numbers = #tpu.dot_dimension_numbers<[1], [0], [0], [1], [0, 0, 1, 1], [], []>} : vector<2x32xbf16>, vector<32x128xbf16>, vector<2x128xf32> -> vector<2x128xf32>
    %128 = arith.addf %125, %127 : vector<2x128xf32>
    %129 = vector.extract_strided_slice %128 {offsets = [0, 0], sizes = [2, 32], strides = [1, 1]} : vector<2x128xf32> to vector<2x32xf32>
    %130 = arith.negf %129 : vector<2x32xf32>
    %131 = math.exp %130 : vector<2x32xf32>
    %cst_42 = arith.constant 1.000000e+00 : f32
    %132 = vector.broadcast %cst_42 : f32 to vector<2x32xf32>
    %133 = arith.addf %132, %131 : vector<2x32xf32>
    %134 = arith.divf %132, %133 : vector<2x32xf32>
    %135 = vector.extract_strided_slice %128 {offsets = [0, 32], sizes = [2, 32], strides = [1, 1]} : vector<2x128xf32> to vector<2x32xf32>
    %136 = arith.negf %135 : vector<2x32xf32>
    %137 = math.exp %136 : vector<2x32xf32>
    %cst_43 = arith.constant 1.000000e+00 : f32
    %138 = vector.broadcast %cst_43 : f32 to vector<2x32xf32>
    %139 = arith.addf %138, %137 : vector<2x32xf32>
    %140 = arith.divf %138, %139 : vector<2x32xf32>
    %141 = vector.extract_strided_slice %128 {offsets = [0, 64], sizes = [2, 32], strides = [1, 1]} : vector<2x128xf32> to vector<2x32xf32>
    %142 = math.tanh %141 : vector<2x32xf32>
    %143 = vector.extract_strided_slice %128 {offsets = [0, 96], sizes = [2, 32], strides = [1, 1]} : vector<2x128xf32> to vector<2x32xf32>
    %144 = arith.negf %143 : vector<2x32xf32>
    %145 = math.exp %144 : vector<2x32xf32>
    %cst_44 = arith.constant 1.000000e+00 : f32
    %146 = vector.broadcast %cst_44 : f32 to vector<2x32xf32>
    %147 = arith.addf %146, %145 : vector<2x32xf32>
    %148 = arith.divf %146, %147 : vector<2x32xf32>
    %149 = arith.mulf %140, %122 : vector<2x32xf32>
    %150 = arith.mulf %134, %142 : vector<2x32xf32>
    %151 = arith.addf %149, %150 : vector<2x32xf32>
    %152 = math.tanh %151 : vector<2x32xf32>
    %153 = arith.mulf %148, %152 : vector<2x32xf32>
    %154 = vector.extract_strided_slice %34 {offsets = [8, 0], sizes = [2, 128], strides = [1, 1]} : vector<16x128xf32> to vector<2x128xf32>
    %155 = arith.truncf %153 : vector<2x32xf32> to vector<2x32xbf16>
    %cst_45 = arith.constant dense<0.000000e+00> : vector<2x128xf32>
    %156 = tpu.matmul %155, %35, %cst_45 {dimension_numbers = #tpu.dot_dimension_numbers<[1], [0], [0], [1], [0, 0, 1, 1], [], []>} : vector<2x32xbf16>, vector<32x128xbf16>, vector<2x128xf32> -> vector<2x128xf32>
    %157 = arith.addf %154, %156 : vector<2x128xf32>
    %158 = vector.extract_strided_slice %157 {offsets = [0, 0], sizes = [2, 32], strides = [1, 1]} : vector<2x128xf32> to vector<2x32xf32>
    %159 = arith.negf %158 : vector<2x32xf32>
    %160 = math.exp %159 : vector<2x32xf32>
    %cst_46 = arith.constant 1.000000e+00 : f32
    %161 = vector.broadcast %cst_46 : f32 to vector<2x32xf32>
    %162 = arith.addf %161, %160 : vector<2x32xf32>
    %163 = arith.divf %161, %162 : vector<2x32xf32>
    %164 = vector.extract_strided_slice %157 {offsets = [0, 32], sizes = [2, 32], strides = [1, 1]} : vector<2x128xf32> to vector<2x32xf32>
    %165 = arith.negf %164 : vector<2x32xf32>
    %166 = math.exp %165 : vector<2x32xf32>
    %cst_47 = arith.constant 1.000000e+00 : f32
    %167 = vector.broadcast %cst_47 : f32 to vector<2x32xf32>
    %168 = arith.addf %167, %166 : vector<2x32xf32>
    %169 = arith.divf %167, %168 : vector<2x32xf32>
    %170 = vector.extract_strided_slice %157 {offsets = [0, 64], sizes = [2, 32], strides = [1, 1]} : vector<2x128xf32> to vector<2x32xf32>
    %171 = math.tanh %170 : vector<2x32xf32>
    %172 = vector.extract_strided_slice %157 {offsets = [0, 96], sizes = [2, 32], strides = [1, 1]} : vector<2x128xf32> to vector<2x32xf32>
    %173 = arith.negf %172 : vector<2x32xf32>
    %174 = math.exp %173 : vector<2x32xf32>
    %cst_48 = arith.constant 1.000000e+00 : f32
    %175 = vector.broadcast %cst_48 : f32 to vector<2x32xf32>
    %176 = arith.addf %175, %174 : vector<2x32xf32>
    %177 = arith.divf %175, %176 : vector<2x32xf32>
    %178 = arith.mulf %169, %151 : vector<2x32xf32>
    %179 = arith.mulf %163, %171 : vector<2x32xf32>
    %180 = arith.addf %178, %179 : vector<2x32xf32>
    %181 = math.tanh %180 : vector<2x32xf32>
    %182 = arith.mulf %177, %181 : vector<2x32xf32>
    %183 = vector.extract_strided_slice %34 {offsets = [10, 0], sizes = [2, 128], strides = [1, 1]} : vector<16x128xf32> to vector<2x128xf32>
    %184 = arith.truncf %182 : vector<2x32xf32> to vector<2x32xbf16>
    %cst_49 = arith.constant dense<0.000000e+00> : vector<2x128xf32>
    %185 = tpu.matmul %184, %35, %cst_49 {dimension_numbers = #tpu.dot_dimension_numbers<[1], [0], [0], [1], [0, 0, 1, 1], [], []>} : vector<2x32xbf16>, vector<32x128xbf16>, vector<2x128xf32> -> vector<2x128xf32>
    %186 = arith.addf %183, %185 : vector<2x128xf32>
    %187 = vector.extract_strided_slice %186 {offsets = [0, 0], sizes = [2, 32], strides = [1, 1]} : vector<2x128xf32> to vector<2x32xf32>
    %188 = arith.negf %187 : vector<2x32xf32>
    %189 = math.exp %188 : vector<2x32xf32>
    %cst_50 = arith.constant 1.000000e+00 : f32
    %190 = vector.broadcast %cst_50 : f32 to vector<2x32xf32>
    %191 = arith.addf %190, %189 : vector<2x32xf32>
    %192 = arith.divf %190, %191 : vector<2x32xf32>
    %193 = vector.extract_strided_slice %186 {offsets = [0, 32], sizes = [2, 32], strides = [1, 1]} : vector<2x128xf32> to vector<2x32xf32>
    %194 = arith.negf %193 : vector<2x32xf32>
    %195 = math.exp %194 : vector<2x32xf32>
    %cst_51 = arith.constant 1.000000e+00 : f32
    %196 = vector.broadcast %cst_51 : f32 to vector<2x32xf32>
    %197 = arith.addf %196, %195 : vector<2x32xf32>
    %198 = arith.divf %196, %197 : vector<2x32xf32>
    %199 = vector.extract_strided_slice %186 {offsets = [0, 64], sizes = [2, 32], strides = [1, 1]} : vector<2x128xf32> to vector<2x32xf32>
    %200 = math.tanh %199 : vector<2x32xf32>
    %201 = vector.extract_strided_slice %186 {offsets = [0, 96], sizes = [2, 32], strides = [1, 1]} : vector<2x128xf32> to vector<2x32xf32>
    %202 = arith.negf %201 : vector<2x32xf32>
    %203 = math.exp %202 : vector<2x32xf32>
    %cst_52 = arith.constant 1.000000e+00 : f32
    %204 = vector.broadcast %cst_52 : f32 to vector<2x32xf32>
    %205 = arith.addf %204, %203 : vector<2x32xf32>
    %206 = arith.divf %204, %205 : vector<2x32xf32>
    %207 = arith.mulf %198, %180 : vector<2x32xf32>
    %208 = arith.mulf %192, %200 : vector<2x32xf32>
    %209 = arith.addf %207, %208 : vector<2x32xf32>
    %210 = math.tanh %209 : vector<2x32xf32>
    %211 = arith.mulf %206, %210 : vector<2x32xf32>
    %212 = vector.extract_strided_slice %34 {offsets = [12, 0], sizes = [2, 128], strides = [1, 1]} : vector<16x128xf32> to vector<2x128xf32>
    %213 = arith.truncf %211 : vector<2x32xf32> to vector<2x32xbf16>
    %cst_53 = arith.constant dense<0.000000e+00> : vector<2x128xf32>
    %214 = tpu.matmul %213, %35, %cst_53 {dimension_numbers = #tpu.dot_dimension_numbers<[1], [0], [0], [1], [0, 0, 1, 1], [], []>} : vector<2x32xbf16>, vector<32x128xbf16>, vector<2x128xf32> -> vector<2x128xf32>
    %215 = arith.addf %212, %214 : vector<2x128xf32>
    %216 = vector.extract_strided_slice %215 {offsets = [0, 0], sizes = [2, 32], strides = [1, 1]} : vector<2x128xf32> to vector<2x32xf32>
    %217 = arith.negf %216 : vector<2x32xf32>
    %218 = math.exp %217 : vector<2x32xf32>
    %cst_54 = arith.constant 1.000000e+00 : f32
    %219 = vector.broadcast %cst_54 : f32 to vector<2x32xf32>
    %220 = arith.addf %219, %218 : vector<2x32xf32>
    %221 = arith.divf %219, %220 : vector<2x32xf32>
    %222 = vector.extract_strided_slice %215 {offsets = [0, 32], sizes = [2, 32], strides = [1, 1]} : vector<2x128xf32> to vector<2x32xf32>
    %223 = arith.negf %222 : vector<2x32xf32>
    %224 = math.exp %223 : vector<2x32xf32>
    %cst_55 = arith.constant 1.000000e+00 : f32
    %225 = vector.broadcast %cst_55 : f32 to vector<2x32xf32>
    %226 = arith.addf %225, %224 : vector<2x32xf32>
    %227 = arith.divf %225, %226 : vector<2x32xf32>
    %228 = vector.extract_strided_slice %215 {offsets = [0, 64], sizes = [2, 32], strides = [1, 1]} : vector<2x128xf32> to vector<2x32xf32>
    %229 = math.tanh %228 : vector<2x32xf32>
    %230 = vector.extract_strided_slice %215 {offsets = [0, 96], sizes = [2, 32], strides = [1, 1]} : vector<2x128xf32> to vector<2x32xf32>
    %231 = arith.negf %230 : vector<2x32xf32>
    %232 = math.exp %231 : vector<2x32xf32>
    %cst_56 = arith.constant 1.000000e+00 : f32
    %233 = vector.broadcast %cst_56 : f32 to vector<2x32xf32>
    %234 = arith.addf %233, %232 : vector<2x32xf32>
    %235 = arith.divf %233, %234 : vector<2x32xf32>
    %236 = arith.mulf %227, %209 : vector<2x32xf32>
    %237 = arith.mulf %221, %229 : vector<2x32xf32>
    %238 = arith.addf %236, %237 : vector<2x32xf32>
    %239 = math.tanh %238 : vector<2x32xf32>
    %240 = arith.mulf %235, %239 : vector<2x32xf32>
    %241 = vector.extract_strided_slice %34 {offsets = [14, 0], sizes = [2, 128], strides = [1, 1]} : vector<16x128xf32> to vector<2x128xf32>
    %242 = arith.truncf %240 : vector<2x32xf32> to vector<2x32xbf16>
    %cst_57 = arith.constant dense<0.000000e+00> : vector<2x128xf32>
    %243 = tpu.matmul %242, %35, %cst_57 {dimension_numbers = #tpu.dot_dimension_numbers<[1], [0], [0], [1], [0, 0, 1, 1], [], []>} : vector<2x32xbf16>, vector<32x128xbf16>, vector<2x128xf32> -> vector<2x128xf32>
    %244 = arith.addf %241, %243 : vector<2x128xf32>
    %245 = vector.extract_strided_slice %244 {offsets = [0, 0], sizes = [2, 32], strides = [1, 1]} : vector<2x128xf32> to vector<2x32xf32>
    %246 = arith.negf %245 : vector<2x32xf32>
    %247 = math.exp %246 : vector<2x32xf32>
    %cst_58 = arith.constant 1.000000e+00 : f32
    %248 = vector.broadcast %cst_58 : f32 to vector<2x32xf32>
    %249 = arith.addf %248, %247 : vector<2x32xf32>
    %250 = arith.divf %248, %249 : vector<2x32xf32>
    %251 = vector.extract_strided_slice %244 {offsets = [0, 32], sizes = [2, 32], strides = [1, 1]} : vector<2x128xf32> to vector<2x32xf32>
    %252 = arith.negf %251 : vector<2x32xf32>
    %253 = math.exp %252 : vector<2x32xf32>
    %cst_59 = arith.constant 1.000000e+00 : f32
    %254 = vector.broadcast %cst_59 : f32 to vector<2x32xf32>
    %255 = arith.addf %254, %253 : vector<2x32xf32>
    %256 = arith.divf %254, %255 : vector<2x32xf32>
    %257 = vector.extract_strided_slice %244 {offsets = [0, 64], sizes = [2, 32], strides = [1, 1]} : vector<2x128xf32> to vector<2x32xf32>
    %258 = math.tanh %257 : vector<2x32xf32>
    %259 = vector.extract_strided_slice %244 {offsets = [0, 96], sizes = [2, 32], strides = [1, 1]} : vector<2x128xf32> to vector<2x32xf32>
    %260 = arith.negf %259 : vector<2x32xf32>
    %261 = math.exp %260 : vector<2x32xf32>
    %cst_60 = arith.constant 1.000000e+00 : f32
    %262 = vector.broadcast %cst_60 : f32 to vector<2x32xf32>
    %263 = arith.addf %262, %261 : vector<2x32xf32>
    %264 = arith.divf %262, %263 : vector<2x32xf32>
    %265 = arith.mulf %256, %238 : vector<2x32xf32>
    %266 = arith.mulf %250, %258 : vector<2x32xf32>
    %267 = arith.addf %265, %266 : vector<2x32xf32>
    %268 = math.tanh %267 : vector<2x32xf32>
    %269 = arith.mulf %264, %268 : vector<2x32xf32>
    %270 = vector.shape_cast %66 : vector<2x32xf32> to vector<2x1x32xf32>
    %271 = vector.shape_cast %95 : vector<2x32xf32> to vector<2x1x32xf32>
    %272 = vector.shape_cast %124 : vector<2x32xf32> to vector<2x1x32xf32>
    %273 = vector.shape_cast %153 : vector<2x32xf32> to vector<2x1x32xf32>
    %274 = vector.shape_cast %182 : vector<2x32xf32> to vector<2x1x32xf32>
    %275 = vector.shape_cast %211 : vector<2x32xf32> to vector<2x1x32xf32>
    %276 = vector.shape_cast %240 : vector<2x32xf32> to vector<2x1x32xf32>
    %277 = vector.shape_cast %269 : vector<2x32xf32> to vector<2x1x32xf32>
    %278 = tpu.concatenate %270, %271, %272, %273, %274, %275, %276, %277 in 1 : vector<2x1x32xf32>, vector<2x1x32xf32>, vector<2x1x32xf32>, vector<2x1x32xf32>, vector<2x1x32xf32>, vector<2x1x32xf32>, vector<2x1x32xf32>, vector<2x1x32xf32> -> vector<2x8x32xf32>
    %279 = vector.shape_cast %278 : vector<2x8x32xf32> to vector<16x32xf32>
    %280 = arith.truncf %279 : vector<16x32xf32> to vector<16x32xbf16>
    %c0_61 = arith.constant 0 : index
    %c0_62 = arith.constant 0 : index
    %281 = vector.load %arg12[%c0_61, %c0_62] : memref<32x128xbf16, #tpu.memory_space<vmem>>, vector<32x128xbf16>
    %cst_63 = arith.constant dense<0.000000e+00> : vector<16x128xf32>
    %282 = tpu.matmul %280, %281, %cst_63 {dimension_numbers = #tpu.dot_dimension_numbers<[1], [0], [0], [1], [0, 0, 1, 1], [], []>} : vector<16x32xbf16>, vector<32x128xbf16>, vector<16x128xf32> -> vector<16x128xf32>
    %c0_64 = arith.constant 0 : index
    %c0_65 = arith.constant 0 : index
    %283 = vector.load %arg13[%c0_64, %c0_65] : memref<1x128xf32, #tpu.memory_space<vmem>>, vector<1x128xf32>
    %284 = vector.broadcast %283 : vector<1x128xf32> to vector<16x128xf32>
    %285 = arith.addf %282, %284 : vector<16x128xf32>
    %286 = vector.shape_cast %285 : vector<16x128xf32> to vector<2x8x128xf32>
    %c0_66 = arith.constant 0 : index
    %c0_67 = arith.constant 0 : index
    %c0_68 = arith.constant 0 : index
    %287 = vector.load %arg14[%c0_66, %c0_67, %c0_68] : memref<2x8x128xf32, #tpu.memory_space<vmem>>, vector<2x8x128xf32>
    tpu.vector_store %arg14[%c0_66, %c0_67, %c0_68], %286 {strides = array<i32>} : memref<2x8x128xf32, #tpu.memory_space<vmem>>, vector<2x8x128xf32>,
    %c0_69 = arith.constant 0 : index
    %c0_70 = arith.constant 0 : index
    %288 = vector.load %arg15[%c0_69, %c0_70] : memref<2x32xf32, #tpu.memory_space<vmem>>, vector<2x32xf32>
    tpu.vector_store %arg15[%c0_69, %c0_70], %269 {strides = array<i32>} : memref<2x32xf32, #tpu.memory_space<vmem>>, vector<2x32xf32>,
    %c0_71 = arith.constant 0 : index
    %c0_72 = arith.constant 0 : index
    %289 = vector.load %arg16[%c0_71, %c0_72] : memref<2x32xf32, #tpu.memory_space<vmem>>, vector<2x32xf32>
    tpu.vector_store %arg16[%c0_71, %c0_72], %267 {strides = array<i32>} : memref<2x32xf32, #tpu.memory_space<vmem>>, vector<2x32xf32>,
    return
  }
  func.func @transform_0(%arg0: i32) -> (i32, i32) {
    %c0_i32 = arith.constant 0 : i32
    %c0_i32_0 = arith.constant 0 : i32
    %c0_i32_1 = arith.constant 0 : i32
    return %c0_i32, %c0_i32_0 : i32, i32
  }
  func.func @transform_1(%arg0: i32) -> (i32, i32) {
    %c0_i32 = arith.constant 0 : i32
    %c0_i32_0 = arith.constant 0 : i32
    %c0_i32_1 = arith.constant 0 : i32
    return %c0_i32, %c0_i32_0 : i32, i32
  }
  func.func @transform_2(%arg0: i32) -> (i32, i32) {
    %c0_i32 = arith.constant 0 : i32
    %c0_i32_0 = arith.constant 0 : i32
    %c0_i32_1 = arith.constant 0 : i32
    return %c0_i32, %c0_i32_0 : i32, i32
  }
  func.func @transform_3(%arg0: i32) -> (i32, i32) {
    %c0_i32 = arith.constant 0 : i32
    %c0_i32_0 = arith.constant 0 : i32
    %c0_i32_1 = arith.constant 0 : i32
    return %c0_i32, %c0_i32_0 : i32, i32
  }
  func.func @transform_4(%arg0: i32) -> (i32, i32) {
    %c0_i32 = arith.constant 0 : i32
    %c0_i32_0 = arith.constant 0 : i32
    %c0_i32_1 = arith.constant 0 : i32
    return %c0_i32, %c0_i32_0 : i32, i32
  }
  func.func @transform_5(%arg0: i32) -> (i32, i32) {
    %c0_i32 = arith.constant 0 : i32
    %c0_i32_0 = arith.constant 0 : i32
    %c0_i32_1 = arith.constant 0 : i32
    return %c0_i32, %c0_i32_0 : i32, i32
  }
  func.func @transform_6(%arg0: i32) -> (i32, i32) {
    %c0_i32 = arith.constant 0 : i32
    %c0_i32_0 = arith.constant 0 : i32
    %c0_i32_1 = arith.constant 0 : i32
    return %c0_i32, %c0_i32_0 : i32, i32
  }
  func.func @transform_7(%arg0: i32) -> (i32, i32) {
    %c0_i32 = arith.constant 0 : i32
    %c0_i32_0 = arith.constant 0 : i32
    %c0_i32_1 = arith.constant 0 : i32
    return %c0_i32, %c0_i32_0 : i32, i32
  }
  func.func @transform_8(%arg0: i32) -> (i32, i32) {
    %c0_i32 = arith.constant 0 : i32
    %c0_i32_0 = arith.constant 0 : i32
    %c0_i32_1 = arith.constant 0 : i32
    return %c0_i32, %c0_i32_0 : i32, i32
  }
  func.func @transform_9(%arg0: i32) -> (i32, i32) {
    %c0_i32 = arith.constant 0 : i32
    %c0_i32_0 = arith.constant 0 : i32
    %c0_i32_1 = arith.constant 0 : i32
    return %c0_i32, %c0_i32_0 : i32, i32
  }
  func.func @transform_10(%arg0: i32) -> (i32, i32) {
    %c0_i32 = arith.constant 0 : i32
    %c0_i32_0 = arith.constant 0 : i32
    %c0_i32_1 = arith.constant 0 : i32
    return %c0_i32, %c0_i32_0 : i32, i32
  }
  func.func @transform_11(%arg0: i32) -> (i32, i32) {
    %c0_i32 = arith.constant 0 : i32
    %c0_i32_0 = arith.constant 0 : i32
    %c0_i32_1 = arith.constant 0 : i32
    return %c0_i32, %c0_i32_0 : i32, i32
  }
  func.func @transform_12(%arg0: i32) -> (i32, i32) {
    %c0_i32 = arith.constant 0 : i32
    %c0_i32_0 = arith.constant 0 : i32
    %c0_i32_1 = arith.constant 0 : i32
    return %c0_i32, %c0_i32_0 : i32, i32
  }
  func.func @transform_13(%arg0: i32) -> (i32, i32, i32) {
    %c0_i32 = arith.constant 0 : i32
    %c0_i32_0 = arith.constant 0 : i32
    %c0_i32_1 = arith.constant 0 : i32
    %c0_i32_2 = arith.constant 0 : i32
    return %c0_i32, %c0_i32_0, %c0_i32_1 : i32, i32, i32
  }
  func.func @transform_14(%arg0: i32) -> (i32, i32) {
    %c0_i32 = arith.constant 0 : i32
    %c0_i32_0 = arith.constant 0 : i32
    %c0_i32_1 = arith.constant 0 : i32
    return %c0_i32, %c0_i32_0 : i32, i32
  }
  func.func @transform_15(%arg0: i32) -> (i32, i32) {
    %c0_i32 = arith.constant 0 : i32
    %c0_i32_0 = arith.constant 0 : i32
    %c0_i32_1 = arith.constant 0 : i32
    return %c0_i32, %c0_i32_0 : i32, i32
  }
}

</mosaic_0001>

<bundles_post_ra>
// kernel: caption_model_forward.1
= control target key start
LH: loop header
LB: loop body
LE: loop exit
PB: predicated region body
PF: predicated region fallthrough
CT: control target
= control target key end

     0   :  { %21 = vsyncpa [#allocation3], 0  ;;  %vm105_vm0 = vcmask 1044480   ;;  %vm106_vm1 = vcmask 1045504   ;;  %v2344_v4 = vmov 65535   ;;  %v2345_v6 = vmov 0   ;;  %s2849_s0 = inlined_call_operand.vmem [shape: s32[14,1], index: 0, kind: input, shape index: {}]   ;;  %s2850_s1 = inlined_call_operand.vmem [shape: bf16[27,512], index: 1, kind: input, shape index: {}]   ;;  %s2851_s2 = inlined_call_operand.vmem [shape: bf16[8,27], index: 2, kind: input, shape index: {}]   ;;  %s2852_s3 = inlined_call_operand.vmem [shape: f32[8,1], index: 3, kind: input, shape index: {}]   ;;  %s2853_s4 = inlined_call_operand.vmem [shape: bf16[512,2], index: 4, kind: input, shape index: {}]   ;;  %s2854_s5 = inlined_call_operand.vmem [shape: bf16[8,32], index: 5, kind: input, shape index: {}]   ;;  %s2855_s6 = inlined_call_operand.vmem [shape: f32[1,32], index: 6, kind: input, shape index: {}]   ;;  %s2856_s7 = inlined_call_operand.vmem [shape: bf16[128,32], index: 7, kind: input, shape index: {}]   ;;  %s2857_s8 = inlined_call_operand.vmem [shape: bf16[32,128], index: 8, kind: input, shape index: {}]   ;;  %s2858_s9 = inlined_call_operand.vmem [shape: bf16[32,128], index: 9, kind: input, shape index: {}]   ;;  %s2859_s10 = inlined_call_operand.vmem [shape: f32[1,128], index: 10, kind: input, shape index: {}]   ;;  %s2860_s11 = inlined_call_operand.vmem [shape: bf16[32,128], index: 11, kind: input, shape index: {}]   ;;  %s2861_s12 = inlined_call_operand.vmem [shape: f32[1,128], index: 12, kind: input, shape index: {}]   ;;  %s2862_s13 = inlined_call_operand.hbm [shape: f32[2,8,128], index: 13, kind: output, shape index: {0}]   ;;  %s2863_s14 = inlined_call_operand.hbm [shape: f32[2,32], index: 14, kind: output, shape index: {1}]   ;;  %s2864_s15 = inlined_call_operand.hbm [shape: f32[2,32], index: 15, kind: output, shape index: {2}]  }
   0x1   :  { %v2152_v0 = vld [vmem:[%s2850_s1 + $0x4] ss:$16 sps:$4 sm:$0xff]   ;;  %v2154_v1 = vld [vmem:[%s2850_s1 + $0xc] ss:$16 sps:$4 sm:$0xff]   ;;  %v2156_v2 = vld [vmem:[%s2850_s1] ss:$16 sps:$4 sm:$0xff]   ;;  %153 = vmatprep.mubr.bf16.mxu0 %v2345_v6  ;;  %194 = vmatprep.mubr.bf16.mxu1 %v2345_v6 }
   0x2   :  { %121 = vmatprep.subr.bf16.mxu0 %v2152_v0  ;;  %v2157_v3 = vld [vmem:[%s2850_s1 + $0x8] ss:$16 sps:$4 sm:$0xff]   ;;  %v107_v5 = vsel %vm105_vm0, 4294967295, %v2344_v4  ;;  %162 = vmatprep.subr.bf16.mxu1 %v2154_v1  ;;  %v2158_v7 = vld [vmem:[%s2850_s1 + $0x24] ss:$16 sps:$4 sm:$0x3f]  }
   0x3   :  { %v108_v8 = vsel %vm106_vm1, %v107_v5, 0  ;;  %122 = vmatpush1.bf16.msra.mxu0 %v2156_v2  ;;  %163 = vmatpush1.bf16.msra.mxu1 %v2157_v3  ;;  %v2160_v9 = vld [vmem:[%s2850_s1 + $0x2c] ss:$16 sps:$4 sm:$0x3f]   ;;  %v59_v14 = vld [vmem:[%s2852_s3] sm:$0xff]  ;;  %vm101_vm2 = vcmask 220160  }
   0x4   :  { %v113_v10 = vand.u32 %v2158_v7, %v108_v8  ;;  %v2162_v11 = vld [vmem:[%s2850_s1 + $0x20] ss:$16 sps:$4 sm:$0x3f]   ;;  %v2163_v12 = vld [vmem:[%s2850_s1 + $0x28] ss:$16 sps:$4 sm:$0x3f]   ;;  %2150 = vset.pattern.permute.xlu0 %v2345_v6  ;;  %2151 = vset.pattern.permute.xlu1 %v2345_v6  ;;  %v119_v13 = vand.u32 %v2160_v9, %v108_v8 }
   0x5   :  { %v622_v15 = vld [vmem:[%s2849_s0 + $0x8] sm:$0x3f]  ;;  %v110_v16 = vand.u32 %v2162_v11, %v108_v8  ;;  %v116_v17 = vand.u32 %v2163_v12, %v108_v8  ;;  %v50_v18 = vld [vmem:[%s2851_s2] sm:$0xf]  ;;  %62 = vperm.xlu0 %2150, %v59_v14   ;;  %v2172_v28 = vld [vmem:[%s2853_s4 + $0xd0] sm:$0xff]  }
   0x6   :  { %123 = vmatprep.subr.bf16.mxu0 %v113_v10  ;;  %v621_v19 = vld [vmem:[%s2849_s0] sm:$0xff]  ;;  %164 = vmatprep.subr.bf16.mxu1 %v119_v13  ;;  %v2168_v24 = vld [vmem:[%s2853_s4 + $0xc8] sm:$0xff]   ;;  %v2173_v29 = vld [vmem:[%s2853_s4 + $0x50] sm:$0xff]  }
   0x7   :  { %629 = vperm.xlu1 %2151, %v622_v15   ;;  %v2164_v20 = vld [vmem:[%s2853_s4 + $0xc0] sm:$0xff]   ;;  %124 = vmatpush1.bf16.msra.mxu0 %v110_v16  ;;  %v2169_v25 = vld [vmem:[%s2853_s4 + $0x48] sm:$0xff]   ;;  %v2174_v30 = vld [vmem:[%s2853_s4 + $0x90] sm:$0xff]  }
   0x8   :  { %165 = vmatpush1.bf16.msra.mxu1 %v116_v17  ;;  %v2165_v21 = vld [vmem:[%s2853_s4 + $0x40] sm:$0xff]   ;;  %v2170_v26 = vld [vmem:[%s2853_s4 + $0x88] sm:$0xff]   ;;  %v2175_v31 = vld [vmem:[%s2853_s4 + $0x10] sm:$0xff]  }
   0x9   :  { %1967 = vmatprep.subr.bf16.mxu1 %v2164_v20  ;;  %v2166_v22 = vld [vmem:[%s2853_s4 + $0x80] sm:$0xff]   ;;  %626 = vperm.xlu0 %2150, %v621_v19   ;;  %v2171_v27 = vld [vmem:[%s2853_s4 + $0x8] sm:$0xff]   ;;  %v2176_v32 = vld [vmem:[%s2853_s4 + $0xd8] sm:$0xff]  }
   0xa   :  { %1945 = vmatprep.subr.bf16.mxu0 %v2165_v21  ;;  %v2167_v23 = vld [vmem:[%s2853_s4] sm:$0xff]   ;;  %1872 = vmatmul.mubr.msk.bf16.vlgmr.msra.gmra.mrb[0].mxu0 %vm101_vm2, %v50_v18  ;;  %v2177_v33 = vld [vmem:[%s2853_s4 + $0x58] sm:$0xff]   ;;  %v2184_v40 = vld [vmem:[%s2853_s4 + $0xe8] sm:$0xff]  }
   0xb   :  { %1873 = vmatmul.mubr.msk.bf16.vlgmr.msra.gmra.mrb[0].mxu1 %vm101_vm2, %v50_v18  ;;  %1946 = vmatpush3.bf16.msra.mxu0 %v2167_v23  ;;  %v2178_v34 = vld [vmem:[%s2853_s4 + $0x98] sm:$0xff]   ;;  %v2180_v36 = vld [vmem:[%s2853_s4 + $0xe0] sm:$0xff]   ;;  %v2185_v41 = vld [vmem:[%s2853_s4 + $0x68] sm:$0xff]  }
   0xc   :  { %1968 = vmatpush3.bf16.msra.mxu1 %v2166_v22  ;;  %1947 = vmatprep.subr.bf16.mxu0 %v2169_v25  ;;  %v2179_v35 = vld [vmem:[%s2853_s4 + $0x18] sm:$0xff]   ;;  %v2181_v37 = vld [vmem:[%s2853_s4 + $0x60] sm:$0xff]   ;;  %v2186_v42 = vld [vmem:[%s2853_s4 + $0xa8] sm:$0xff]  }
   0xd   :  { %1969 = vmatprep.subr.bf16.mxu1 %v2168_v24  ;;  %v2182_v38 = vld [vmem:[%s2853_s4 + $0xa0] sm:$0xff]   ;;  %v2187_v43 = vld [vmem:[%s2853_s4 + $0x28] sm:$0xff]  }
   0xe   :  { %v2183_v39 = vld [vmem:[%s2853_s4 + $0x20] sm:$0xff]  }
   0xf   :  { %1948 = vmatpush3.bf16.msra.mxu0 %v2171_v27 }
  0x10   :  { %1970 = vmatpush3.bf16.msra.mxu1 %v2170_v26  ;;  %1949 = vmatprep.subr.bf16.mxu0 %v2173_v29 }
  0x11   :  { %1971 = vmatprep.subr.bf16.mxu1 %v2172_v28 }
  0x13   :  { %1950 = vmatpush3.bf16.msra.mxu0 %v2175_v31 }
  0x14   :  { %1972 = vmatpush3.bf16.msra.mxu1 %v2174_v30  ;;  %1951 = vmatprep.subr.bf16.mxu0 %v2177_v33 }
  0x15   :  { %1973 = vmatprep.subr.bf16.mxu1 %v2176_v32 }
  0x17   :  { %1952 = vmatpush3.bf16.msra.mxu0 %v2179_v35 }
  0x18   :  { %1974 = vmatpush3.bf16.msra.mxu1 %v2178_v34  ;;  %1953 = vmatprep.subr.bf16.mxu0 %v2181_v37 }
  0x19   :  { %1975 = vmatprep.subr.bf16.mxu1 %v2180_v36 }
  0x1b   :  { %1954 = vmatpush3.bf16.msra.mxu0 %v2183_v39 }
  0x1c   :  { %1976 = vmatpush3.bf16.msra.mxu1 %v2182_v38  ;;  %1955 = vmatprep.subr.bf16.mxu0 %v2185_v41 }
  0x1d   :  { %1977 = vmatprep.subr.bf16.mxu1 %v2184_v40 }
  0x1f   :  { %1956 = vmatpush3.bf16.msra.mxu0 %v2187_v43 }
  0x20   :  { %1978 = vmatpush3.bf16.msra.mxu1 %v2186_v42 }
  0x21   :  { %22 = vsyncpa [#allocation5], 0  ;;  %v2188_v44 = vld [vmem:[%s2853_s4 + $0xf0] sm:$0xff]   ;;  %v2192_v48 = vld [vmem:[%s2853_s4 + $0xf8] sm:$0xff]   ;;  %v2346_v52 = vmov 0.0   ;;  %vm2347_vm3 = vmmov 0   ;;  %v623_v17 = vlaneseq }
  0x22   :  { %v2189_v45 = vld [vmem:[%s2853_s4 + $0x70] sm:$0xff]   ;;  %1979 = vmatprep.subr.bf16.mxu1 %v2188_v44  ;;  %v2193_v49 = vld [vmem:[%s2853_s4 + $0x78] sm:$0xff]   ;;  %v2196_v9 = vld [vmem:[%s2856_s7] sm:$0xff]   ;;  %v2348_v23 = vmov 1.0|1.0   ;;  %vm576_vm7 = vcmask 1043456  }
  0x23   :  { %v2190_v46 = vld [vmem:[%s2853_s4 + $0xb0] sm:$0xff]   ;;  %1957 = vmatprep.subr.bf16.mxu0 %v2189_v45  ;;  %v2194_v50 = vld [vmem:[%s2853_s4 + $0xb8] sm:$0xff]   ;;  %v2197_v12 = vld [vmem:[%s2856_s7 + $0x8] sm:$0xff]   ;;  %v624_v19 = vand.u32 127, %v623_v17  ;;  %vm745_vm8 = vcmask 1041408   ;;  %vm572_vm9 = vcmask 64512  }
  0x24   :  { %v2191_v47 = vld [vmem:[%s2853_s4 + $0x30] sm:$0xff]   ;;  %1980 = vmatpush3.bf16.msra.mxu1 %v2190_v46  ;;  %v2195_v51 = vld [vmem:[%s2853_s4 + $0x38] sm:$0xff]   ;;  %v2200_v15 = vld [vmem:[%s2856_s7 + $0x20] sm:$0xff]   ;;  %vm776_vm10 = vcmask 261120   ;;  %s2349_s19 = smov 64   ;;  %vm1721_vm11 = vcmask 1040384  }
  0x25   :  { %1958 = vmatpush3.bf16.msra.mxu0 %v2191_v47  ;;  %1981 = vmatprep.subr.bf16.mxu1 %v2192_v48  ;;  %v2198_v13 = vld [vmem:[%s2856_s7 + $0x10] sm:$0xff]   ;;  %v2199_v14 = vld [vmem:[%s2856_s7 + $0x18] sm:$0xff]   ;;  %v2201_v16 = vld [vmem:[%s2856_s7 + $0x28] sm:$0xff]   ;;  %vm1726_vm12 = vcmask 1042432   ;;  %vm1735_vm13 = vcmask 1046528   ;;  %vm1814_vm14 = vcmask 261126  }
  0x26   :  { %1959 = vmatprep.subr.bf16.mxu0 %v2193_v49  ;;  %v2202_v18 = vld [vmem:[%s2856_s7 + $0x30] sm:$0xff]   ;;  %v2203_v22 = vld [vmem:[%s2856_s7 + $0x38] sm:$0xff]   ;;  %v548_v24 = vld [vmem:[%s2854_s5] sm:$0xf]  ;;  %s2353_s24 = smov [#allocation4]  }
  0x27   :  { %v578_v25 = vsel %vm576_vm7, %v548_v24, 0  ;;  %v2204_v46 = vld [vmem:[%s2857_s8] sm:$0xff]   ;;  %v2205_v47 = vld [vmem:[%s2857_s8 + $0x8] sm:$0xff]   ;;  %s1839_s1 = sshll.u32 %s2353_s24, 4  ;;  %s1840_s1 = int_to_ptr.vmem [resolvable:$true] %s1839_s1 }
  0x28   :  { %1982 = vmatpush3.bf16.msra.mxu1 %v2194_v50  ;;  %v2636_v48 = vld [vmem:[%s2858_s9] sm:$0xff]   ;;  %v2643_v49 = vld [vmem:[%s2858_s9 + $0x8] sm:$0xff]   ;;  %s2274_s25 = scalar_lea.vmem %s1840_s1, 32  ;;  %p2279_p1 = scmp.lt.s32.totalorder %s1840_s1, %s1840_s1 }
  0x29   :  { %1960 = vmatpush3.bf16.msra.mxu0 %v2195_v51  ;;  %2036 = vmatprep.subr.bf16.mxu1 %v2346_v52  ;;  %v1906_v50 = vld [vmem:[%s2855_s6] ss:$0 sm:$0xff]  ;;  %p2275_p0 = scmp.ne.s32.totalorder %s1840_s1, %s2274_s25  ;;  %p2280_p2 = scmp.lt.s32.totalorder %s2274_s25, %s2274_s25 }
  0x2a   :  { %2030 = vmatprep.subr.bf16.mxu0 %v2346_v52 }
  0x2b   :  { %p2281_p3 = por %p2280_p2, %p2279_p1 }
  0x2d   :  { %p2282_p4 = pnand %p2281_p3, %p2275_p0 }
  0x84   :  { %v63_v53 = vpop.permute.xlu0 %62 }
  0x86   :  { %v630_v20 = vpop.permute.xlu1 %629 }
  0x87   :  { %vm632_vm4 = vcmp.eq.s32.totalorder %v630_v20, %v624_v19  ;;  %v2351_v20 = vmov 1966171168  }
  0x88   :  { %v627_v21 = vpop.permute.xlu0 %626 }
  0x89   :  { %vm631_vm5 = vcmp.eq.s32.totalorder %v627_v21, %v624_v19  ;;  %v1455_v21 = vunpack.c.l.s4 %v2351_v20 }
  0x8a   :  { %vm1918_vm6 = vmpackc.low %vm632_vm4, %vm631_vm5 }
  0xdd   :  { %v155_v54 = vpop.f32.mrb[0].mxu0 }
  0xde   :  { %v196_v55 = vpop.f32.mrb[0].mxu1  ;;  %v156_v56 = vadd.f32 %v155_v54, %v63_v53  ;;  %v157_v58 = vpop.f32.mrb[1].mxu0 }
  0xdf   :  { %v197_v57 = vadd.f32 %v196_v55, %v63_v53  ;;  %v198_v59 = vpop.f32.mrb[1].mxu1  ;;  %v158_v60 = vadd.f32 %v157_v58, %v63_v53  ;;  %v159_v62 = vpop.f32.mrb[2].mxu0 }
  0xe0   :  { %v199_v61 = vadd.f32 %v198_v59, %v63_v53  ;;  %v200_v63 = vpop.f32.mrb[2].mxu1  ;;  %v203_v0 = vmax.f32 %v156_v56, 0.0  ;;  %v160_v2 = vpop.f32.mrb[3].mxu0  ;;  %v1920_v62 = vld [vmem:[%s2859_s10] ss:$0 sm:$0xff]  ;;  %s2350_s10 = smov 32  }
  0xe1   :  { %v205_v1 = vmax.f32 %v197_v57, 0.0  ;;  %v201_v3 = vpop.f32.mrb[3].mxu1  ;;  %v204_v4 = vmax.f32 %v158_v60, 0.0 }
  0xe2   :  { %v206_v5 = vmax.f32 %v199_v61, 0.0  ;;  %v207_v10 = vpack.c.bf16 %v203_v0, %v203_v0 }
  0xe3   :  { %v208_v7 = vpack.c.bf16 %v204_v4, %v204_v4  ;;  %v209_v11 = vpack.c.bf16 %v205_v1, %v205_v1 }
  0xe4   :  { %v210_v8 = vpack.c.bf16 %v206_v5, %v206_v5 }
  0xe5   :  { %499 = vmatprep.mubr.bf16.mxu0 %v208_v7 }
  0xe6   :  { %539 = vmatprep.mubr.bf16.mxu1 %v210_v8  ;;  %500 = vmatmul.mubr.bf16.vlgmr.msra.gmra.mrb[4].mxu0 %v207_v10 }
  0xe7   :  { %540 = vmatmul.mubr.bf16.vlgmr.msra.gmra.mrb[4].mxu1 %v209_v11  ;;  %2032 = vmatprep.mubr.msk.bf16.mxu0 %vm2347_vm3, %v2346_v52 }
  0xe8   :  { %2037 = vmatpush3.bf16.msra.mxu1 %v2196_v9  ;;  %2052 = vmatprep.mubr.msk.bf16.mxu1 %vm2347_vm3, %v2346_v52 }
  0xe9   :  { %2038 = vmatprep.subr.bf16.mxu1 %v2346_v52  ;;  %2031 = vmatpush3.bf16.msra.mxu0 %v578_v25 }
  0xea   :  { %2056 = vmatprep.subr.bf16.mxu0 %v2346_v52 }
  0xec   :  { %2039 = vmatpush3.bf16.msra.mxu1 %v2197_v12 }
  0xed   :  { %2040 = vmatprep.subr.bf16.mxu1 %v2346_v52 }
  0xf0   :  { %2041 = vmatpush3.bf16.msra.mxu1 %v2198_v13 }
  0xf1   :  { %2042 = vmatprep.subr.bf16.mxu1 %v2346_v52 }
  0xf4   :  { %2043 = vmatpush3.bf16.msra.mxu1 %v2199_v14 }
  0xf5   :  { %2044 = vmatprep.subr.bf16.mxu1 %v2346_v52 }
  0xf8   :  { %2045 = vmatpush3.bf16.msra.mxu1 %v2200_v15 }
  0xf9   :  { %2046 = vmatprep.subr.bf16.mxu1 %v2346_v52 }
  0xfc   :  { %2047 = vmatpush3.bf16.msra.mxu1 %v2201_v16 }
  0xfd   :  { %2048 = vmatprep.subr.bf16.mxu1 %v2346_v52 }
 0x100   :  { %2049 = vmatpush3.bf16.msra.mxu1 %v2202_v18 }
 0x101   :  { %2050 = vmatprep.subr.bf16.mxu1 %v2346_v52 }
 0x104   :  { %2051 = vmatpush3.bf16.msra.mxu1 %v2203_v22  ;;  %v1456_v22 = vunpack.c.0.s8 %v1455_v21 }
 0x105   :  { %2088 = vmatprep.subr.bf16.mxu1 %v2346_v52 }
 0x107   :  { %2053 = vmatmul.mubr.msk.bf16.vlgmr.msra.gmra.mrb[8].mxu1 %vm1918_vm6, %v2348_v23  ;;  %v1458_v23 = vshrl.u32 %v623_v17, 7 }
 0x108   :  { %2092 = vmatprep.mubr.msk.bf16.mxu1 %vm2347_vm3, %v2346_v52  ;;  %2089 = vmatpush3.bf16.msra.mxu1 %v2636_v48 }
 0x109   :  { %2090 = vmatprep.subr.bf16.mxu1 %v2346_v52  ;;  %v2677_v24 = vsub.s32 %v1456_v22, %v1458_v23 }
 0x10c   :  { %2091 = vmatpush3.bf16.msra.mxu1 %v2643_v49 }
 0x10d   :  { %2104 = vmatprep.subr.bf16.mxu1 %v2346_v52 }
 0x1b9   :  { %v1961_v26 = vpop.f32.mrb[4].mxu0 }
 0x1ba   :  { %v1983_v27 = vpop.f32.mrb[4].mxu1  ;;  %v1962_v28 = vpop.f32.mrb[5].mxu0 }
 0x1bb   :  { %v1984_v29 = vpop.f32.mrb[5].mxu1  ;;  %v1963_v30 = vadd.f32 %v1962_v28, %v1961_v26  ;;  %v1964_v32 = vpop.f32.mrb[6].mxu0 }
 0x1bc   :  { %v1985_v31 = vadd.f32 %v1984_v29, %v1983_v27  ;;  %v1986_v33 = vpop.f32.mrb[6].mxu1  ;;  %v1965_v34 = vpop.f32.mrb[7].mxu0 }
 0x1bd   :  { %v1987_v35 = vpop.f32.mrb[7].mxu1 }
 0x1be   :  { %v542_v36 = vadd.f32 %v1985_v31, %v1963_v30 }
 0x1c0   :  { %v547_v37 = vpack.c.bf16 %v542_v36, %v542_v36 }
 0x1c2   :  { %556 = vxpose.xlu1.c.b16.start.end [1/1] (short) (narrow) %v547_v37, 16 }
 0x1da   :  { %v736_v38 = vpop.f32.mrb[8].mxu1 }
 0x1db   :  { %v2054_v39 = vpop.f32.mrb[9].mxu1  ;;  %v746_v41 = vrot.slane %v736_v38, 6 }
 0x1dc   :  { %v739_v40 = vpop.f32.mrb[10].mxu1 }
 0x1dd   :  { %v747_v42 = vrot.slane %v739_v40, 6  ;;  %v2055_v43 = vpop.f32.mrb[11].mxu1 }
 0x1df   :  { %v748_v44 = vsel %vm745_vm8, %v746_v41, %v747_v42 }
 0x228   :  { %v564_v45 = vpop.trf.xlu1 }
 0x229   :  { %2033 = vmatmul.mubr.msk.bf16.vlgmr.msra.gmra.mrb[8].mxu0 %vm572_vm9, %v564_v45 }
 0x22a   :  { %2060 = vmatprep.mubr.msk.bf16.mxu0 %vm2347_vm3, %v2346_v52  ;;  %2057 = vmatpush3.bf16.msra.mxu0 %v2204_v46 }
 0x22b   :  { %2058 = vmatprep.subr.bf16.mxu0 %v2346_v52 }
 0x22e   :  { %2059 = vmatpush3.bf16.msra.mxu0 %v2205_v47 }
 0x22f   :  { %2064 = vmatprep.subr.bf16.mxu0 %v2346_v52 }
 0x2fc   :  { %v614_v51 = vpop.f32.mrb[8].mxu0 }
 0x2fd   :  { %v615_v53 = vadd.f32 %v1906_v50, %v614_v51  ;;  %v2034_v54 = vpop.f32.mrb[9].mxu0 }
 0x2fe   :  { %v617_v55 = vpop.f32.mrb[10].mxu0 }
 0x2ff   :  { %v620_v56 = vmax.f32 %v615_v53, 0.0  ;;  %v2035_v57 = vpop.f32.mrb[11].mxu0 }
 0x300   :  { %v2695_v57 = vsub.s32 0, %v1458_v23 }
 0x301   :  { %v751_v58 = vsel %vm745_vm8, %v620_v56, %v746_v41 }
 0x302   :  { %v752_v59 = vpack.c.bf16 %v748_v44, %v751_v58 }
 0x304   :  { %2061 = vmatmul.mubr.msk.bf16.vlgmr.msra.gmra.mrb[12].mxu0 %vm776_vm10, %v752_v59 }
 0x305   :  { %2065 = vmatpush3.bf16.msra.mxu0 %v2636_v48  ;;  %2068 = vmatprep.mubr.msk.bf16.mxu0 %vm2347_vm3, %v2346_v52 }
 0x306   :  { %2066 = vmatprep.subr.bf16.mxu0 %v2346_v52 }
 0x309   :  { %2067 = vmatpush3.bf16.msra.mxu0 %v2643_v49 }
 0x30a   :  { %2072 = vmatprep.subr.bf16.mxu0 %v2346_v52 }
 0x30c   :  { %2069 = vmatmul.mubr.bf16.vlgmr.msra.gmra.mrb[16].mxu0 %v2345_v6 }
 0x30d   :  { %2073 = vmatpush3.bf16.msra.mxu0 %v2636_v48  ;;  %2076 = vmatprep.mubr.msk.bf16.mxu0 %vm2347_vm3, %v2346_v52 }
 0x30e   :  { %2074 = vmatprep.subr.bf16.mxu0 %v2346_v52 }
 0x311   :  { %2075 = vmatpush3.bf16.msra.mxu0 %v2643_v49 }
 0x312   :  { %2080 = vmatprep.subr.bf16.mxu0 %v2346_v52 }
 0x3d7   :  { %v814_v60 = vpop.f32.mrb[12].mxu0 }
 0x3d8   :  { %v2062_v61 = vpop.f32.mrb[13].mxu0  ;;  %v2670_v1 = vadd.f32 %v1920_v62, %v814_v60 }
 0x3d9   :  { %v817_v63 = vpop.f32.mrb[14].mxu0 }
 0x3da   :  { %v2668_v0 = vadd.f32 %v1920_v62, %v817_v63  ;;  %v2063_v6 = vpop.f32.mrb[15].mxu0 }
 0x3df   :  { %v874_v2 = vpop.f32.mrb[16].mxu0 }
 0x3e0   :  { %v880_v3 = vadd.f32 %v874_v2, %v2670_v1  ;;  %v2070_v4 = vpop.f32.mrb[17].mxu0 }
 0x3e1   :  { %v877_v5 = vpop.f32.mrb[18].mxu0 }
 0x3e2   :  { %2210 = vtanh.f32 %v880_v3  ;;  %v2071_v7 = vpop.f32.mrb[19].mxu0  ;;  %v1926_v9 = vmul.f32 -1.442695, %v880_v3 }
 0x3e4   :  { %2212 = vpow2.f32 %v1926_v9 }
 0x3ec   :  { %v2211_v8 = vpop.eup %2210 }
 0x3ed   :  { %890 = vrot.lane.b32.xlu0 %v2211_v8, %s2349_s19 }
 0x3ee   :  { %v2213_v10 = vpop.eup %2212 }
 0x3ef   :  { %v884_v11 = vadd.f32 1.0, %v2213_v10 }
 0x3f1   :  { %2214 = vrcp.f32 %v884_v11 }
 0x3fb   :  { %v2215_v12 = vpop.eup %2214 }
 0x3fc   :  { %v888_v15 = vmul.f32 0.0, %v2215_v12 }
 0x45f   :  { %v891_v13 = vpop.permute.xlu0 %890 }
 0x460   :  { %v893_v14 = vmul.f32 %v2215_v12, %v891_v13 }
 0x462   :  { %895 = vrot.lane.b32.xlu0 %v893_v14, %s2350_s10 }
 0x4d4   :  { %v896_v16 = vpop.permute.xlu0 %895 }
 0x4d5   :  { %v898_v18 = vadd.f32 %v896_v16, %v888_v15 }
 0x4d7   :  { %2216 = vtanh.f32 %v898_v18  ;;  %v964_v45 = vrot.slane %v898_v18, 6 }
 0x4e1   :  { %v2217_v19 = vpop.eup %2216 }
 0x4e2   :  { %901 = vrot.lane.b32.xlu0 %v2217_v19, %s2349_s19 }
 0x554   :  { %v902_v25 = vpop.permute.xlu0 %901 }
 0x555   :  { %v904_v26 = vmul.f32 %v2215_v12, %v902_v25 }
 0x557   :  { %v905_v27 = vpack.c.bf16 %v904_v26, %v904_v26  ;;  %v1460_v28 = vrot.slane %v904_v26, %v2677_v24 }
 0x559   :  { %v1461_v29 = vcombine.high %v1460_v28, %v1460_v28  ;;  %v1468_v30 = vrot.slane %v1460_v28, %v2677_v24  ;;  %907 = vrot.lane.b32.xlu0 %v905_v27, %s2350_s10 }
 0x55b   :  { %v1475_v31 = vrot.slane %v1461_v29, %v2677_v24 }
 0x5cb   :  { %v908_v32 = vpop.permute.xlu0 %907 }
 0x5cc   :  { %2077 = vmatmul.mubr.msk.bf16.vlgmr.msra.gmra.mrb[20].mxu0 %vm776_vm10, %v908_v32 }
 0x5cd   :  { %2081 = vmatpush3.bf16.msra.mxu0 %v2636_v48  ;;  %2084 = vmatprep.mubr.msk.bf16.mxu0 %vm2347_vm3, %v2346_v52 }
 0x5ce   :  { %2082 = vmatprep.subr.bf16.mxu0 %v2346_v52 }
 0x5d1   :  { %2083 = vmatpush3.bf16.msra.mxu0 %v2643_v49 }
 0x5d2   :  { %2096 = vmatprep.subr.bf16.mxu0 %v2346_v52 }
 0x69f   :  { %v946_v17 = vpop.f32.mrb[20].mxu0 }
 0x6a0   :  { %v953_v33 = vrot.slane %v946_v17, 6  ;;  %v2078_v34 = vpop.f32.mrb[21].mxu0 }
 0x6a1   :  { %v949_v35 = vpop.f32.mrb[22].mxu0 }
 0x6a2   :  { %v955_v36 = vadd.f32 %v953_v33, %v2670_v1  ;;  %v2079_v37 = vpop.f32.mrb[23].mxu0 }
 0x6a4   :  { %2218 = vtanh.f32 %v955_v36  ;;  %v1928_v39 = vmul.f32 -1.442695, %v955_v36 }
 0x6a6   :  { %2220 = vpow2.f32 %v1928_v39 }
 0x6ae   :  { %v2219_v38 = vpop.eup %2218 }
 0x6af   :  { %968 = vrot.lane.b32.xlu0 %v2219_v38, %s2349_s19 }
 0x6b0   :  { %v2221_v40 = vpop.eup %2220 }
 0x6b1   :  { %v959_v41 = vadd.f32 1.0, %v2221_v40 }
 0x6b3   :  { %2222 = vrcp.f32 %v959_v41 }
 0x6bd   :  { %v2223_v42 = vpop.eup %2222 }
 0x6be   :  { %v966_v46 = vmul.f32 %v2223_v42, %v964_v45 }
 0x721   :  { %v969_v43 = vpop.permute.xlu0 %968 }
 0x722   :  { %v971_v44 = vmul.f32 %v2223_v42, %v969_v43 }
 0x724   :  { %973 = vrot.lane.b32.xlu0 %v971_v44, %s2350_s10 }
 0x796   :  { %v974_v47 = vpop.permute.xlu0 %973 }
 0x797   :  { %v976_v50 = vadd.f32 %v974_v47, %v966_v46 }
 0x799   :  { %2224 = vtanh.f32 %v976_v50  ;;  %v1043_v21 = vrot.slane %v976_v50, 6 }
 0x7a3   :  { %v2225_v51 = vpop.eup %2224 }
 0x7a4   :  { %979 = vrot.lane.b32.xlu0 %v2225_v51, %s2349_s19 }
 0x816   :  { %v980_v53 = vpop.permute.xlu0 %979 }
 0x817   :  { %v982_v54 = vmul.f32 %v2223_v42, %v980_v53 }
 0x819   :  { %v983_v55 = vpack.c.bf16 %v982_v54, %v982_v54  ;;  %v1485_v56 = vrot.slane %v982_v54, %v2677_v24 }
 0x81b   :  { %v985_v58 = vrot.slane %v983_v55, 1  ;;  %v1486_v59 = vcombine.high %v1485_v56, %v1485_v56  ;;  %v1493_v60 = vrot.slane %v1485_v56, %v2677_v24 }
 0x81d   :  { %v1500_v61 = vrot.slane %v1486_v59, %v2677_v24  ;;  %v1501_v62 = vcombine.high %v1493_v60, %v1493_v60  ;;  %986 = vrot.lane.b32.xlu0 %v985_v58, %s2350_s10 }
 0x81f   :  { %v1502_v63 = vcombine.high %v1500_v61, %v1500_v61  ;;  %v1654_v6 = vrot.slane %v1501_v62, %v2695_v57 }
 0x821   :  { %v1658_v2 = vrot.slane %v1502_v63, %v2695_v57  ;;  %v1722_v3 = vsel %vm1721_vm11, %v1468_v30, %v1654_v6 }
 0x823   :  { %v1723_v4 = vsel %vm1721_vm11, %v1475_v31, %v1658_v2 }
 0x88f   :  { %v987_v5 = vpop.permute.xlu0 %986 }
 0x890   :  { %2085 = vmatmul.mubr.msk.bf16.vlgmr.msra.gmra.mrb[24].mxu0 %vm776_vm10, %v987_v5 }
 0x891   :  { %2097 = vmatpush3.bf16.msra.mxu0 %v2636_v48  ;;  %2100 = vmatprep.mubr.msk.bf16.mxu0 %vm2347_vm3, %v2346_v52 }
 0x892   :  { %2098 = vmatprep.subr.bf16.mxu0 %v2346_v52 }
 0x895   :  { %2099 = vmatpush3.bf16.msra.mxu0 %v2643_v49 }
 0x896   :  { %2112 = vmatprep.subr.bf16.mxu0 %v2346_v52 }
 0x963   :  { %v1025_v7 = vpop.f32.mrb[24].mxu0 }
 0x964   :  { %v1032_v8 = vrot.slane %v1025_v7, 4  ;;  %v2086_v9 = vpop.f32.mrb[25].mxu0 }
 0x965   :  { %v1028_v10 = vpop.f32.mrb[26].mxu0 }
 0x966   :  { %v1034_v11 = vadd.f32 %v1032_v8, %v2670_v1  ;;  %v2087_v12 = vpop.f32.mrb[27].mxu0 }
 0x968   :  { %2226 = vtanh.f32 %v1034_v11  ;;  %v1930_v14 = vmul.f32 -1.442695, %v1034_v11 }
 0x96a   :  { %2228 = vpow2.f32 %v1930_v14 }
 0x972   :  { %v2227_v13 = vpop.eup %2226 }
 0x973   :  { %1047 = vrot.lane.b32.xlu1 %v2227_v13, %s2349_s19 }
 0x974   :  { %v2229_v15 = vpop.eup %2228 }
 0x975   :  { %v1038_v16 = vadd.f32 1.0, %v2229_v15 }
 0x977   :  { %2230 = vrcp.f32 %v1038_v16 }
 0x981   :  { %v2231_v18 = vpop.eup %2230 }
 0x982   :  { %v1045_v22 = vmul.f32 %v2231_v18, %v1043_v21 }
 0x9e5   :  { %v1048_v19 = vpop.permute.xlu1 %1047 }
 0x9e6   :  { %v1050_v20 = vmul.f32 %v2231_v18, %v1048_v19 }
 0x9e8   :  { %1052 = vrot.lane.b32.xlu0 %v1050_v20, %s2350_s10 }
 0xa5a   :  { %v1053_v23 = vpop.permute.xlu0 %1052 }
 0xa5b   :  { %v1055_v25 = vadd.f32 %v1053_v23, %v1045_v22 }
 0xa5d   :  { %2232 = vtanh.f32 %v1055_v25  ;;  %v1122_v56 = vrot.slane %v1055_v25, 6 }
 0xa67   :  { %v2233_v26 = vpop.eup %2232 }
 0xa68   :  { %1058 = vrot.lane.b32.xlu1 %v2233_v26, %s2349_s19 }
 0xada   :  { %v1059_v27 = vpop.permute.xlu1 %1058 }
 0xadb   :  { %v1061_v28 = vmul.f32 %v2231_v18, %v1059_v27 }
 0xadd   :  { %v1062_v29 = vpack.c.bf16 %v1061_v28, %v1061_v28  ;;  %v1504_v30 = vcombine.high %v1061_v28, %v1061_v28 }
 0xadf   :  { %v1064_v31 = vrot.slane %v1062_v29, 2  ;;  %v1511_v32 = vrot.slane %v1504_v30, %v2677_v24 }
 0xae1   :  { %v1512_v17 = vcombine.high %v1511_v32, %v1511_v32  ;;  %v1519_v33 = vrot.slane %v1511_v32, %v2677_v24  ;;  %1065 = vrot.lane.b32.xlu0 %v1064_v31, %s2350_s10 }
 0xae3   :  { %v1526_v34 = vrot.slane %v1512_v17, %v2677_v24  ;;  %v1664_v35 = vrot.slane %v1519_v33, %v2695_v57 }
 0xae5   :  { %v1668_v36 = vrot.slane %v1526_v34, %v2695_v57  ;;  %v1724_v37 = vsel %vm745_vm8, %v1722_v3, %v1664_v35 }
 0xae7   :  { %v1725_v38 = vsel %vm745_vm8, %v1723_v4, %v1668_v36 }
 0xb53   :  { %v1066_v39 = vpop.permute.xlu0 %1065 }
 0xb54   :  { %2093 = vmatmul.mubr.msk.bf16.vlgmr.msra.gmra.mrb[12].mxu1 %vm776_vm10, %v1066_v39 }
 0xb55   :  { %2105 = vmatpush3.bf16.msra.mxu1 %v2636_v48  ;;  %2108 = vmatprep.mubr.msk.bf16.mxu1 %vm2347_vm3, %v2346_v52 }
 0xb56   :  { %2106 = vmatprep.subr.bf16.mxu1 %v2346_v52 }
 0xb59   :  { %2107 = vmatpush3.bf16.msra.mxu1 %v2643_v49 }
 0xb5a   :  { %2120 = vmatprep.subr.bf16.mxu1 %v2346_v52 }
 0xc27   :  { %v1104_v40 = vpop.f32.mrb[12].mxu1 }
 0xc28   :  { %v1111_v41 = vrot.slane %v1104_v40, 2  ;;  %v2094_v42 = vpop.f32.mrb[13].mxu1 }
 0xc29   :  { %v1107_v43 = vpop.f32.mrb[14].mxu1 }
 0xc2a   :  { %v1113_v44 = vadd.f32 %v1111_v41, %v2670_v1  ;;  %v2095_v45 = vpop.f32.mrb[15].mxu1 }
 0xc2c   :  { %2234 = vtanh.f32 %v1113_v44  ;;  %v1932_v47 = vmul.f32 -1.442695, %v1113_v44 }
 0xc2e   :  { %2236 = vpow2.f32 %v1932_v47 }
 0xc36   :  { %v2235_v46 = vpop.eup %2234 }
 0xc37   :  { %1126 = vrot.lane.b32.xlu1 %v2235_v46, %s2349_s19 }
 0xc38   :  { %v2237_v50 = vpop.eup %2236 }
 0xc39   :  { %v1117_v51 = vadd.f32 1.0, %v2237_v50 }
 0xc3b   :  { %2238 = vrcp.f32 %v1117_v51 }
 0xc45   :  { %v2239_v53 = vpop.eup %2238 }
 0xc46   :  { %v1124_v58 = vmul.f32 %v2239_v53, %v1122_v56 }
 0xca9   :  { %v1127_v54 = vpop.permute.xlu1 %1126 }
 0xcaa   :  { %v1129_v55 = vmul.f32 %v2239_v53, %v1127_v54 }
 0xcac   :  { %1131 = vrot.lane.b32.xlu0 %v1129_v55, %s2350_s10 }
 0xd1e   :  { %v1132_v59 = vpop.permute.xlu0 %1131 }
 0xd1f   :  { %v1134_v60 = vadd.f32 %v1132_v59, %v1124_v58 }
 0xd21   :  { %2240 = vtanh.f32 %v1134_v60  ;;  %v1198_v29 = vrot.slane %v1134_v60, 6 }
 0xd2b   :  { %v2241_v1 = vpop.eup %2240 }
 0xd2c   :  { %1137 = vrot.lane.b32.xlu1 %v2241_v1, %s2349_s19 }
 0xd9e   :  { %v1138_v61 = vpop.permute.xlu1 %1137 }
 0xd9f   :  { %v1140_v62 = vmul.f32 %v2239_v53, %v1138_v61 }
 0xda1   :  { %v1141_v63 = vpack.c.bf16 %v1140_v62, %v1140_v62  ;;  %v1528_v6 = vcombine.high %v1140_v62, %v1140_v62 }
 0xda3   :  { %v1143_v2 = vrot.slane %v1141_v63, 3  ;;  %v1535_v3 = vrot.slane %v1528_v6, %v2677_v24 }
 0xda5   :  { %v1536_v4 = vcombine.high %v1535_v3, %v1535_v3  ;;  %v1543_v5 = vrot.slane %v1535_v3, %v2677_v24  ;;  %1144 = vrot.lane.b32.xlu0 %v1143_v2, %s2350_s10 }
 0xda7   :  { %v1550_v7 = vrot.slane %v1536_v4, %v2677_v24  ;;  %v1551_v8 = vcombine.high %v1543_v5, %v1543_v5 }
 0xda9   :  { %v1552_v9 = vcombine.high %v1550_v7, %v1550_v7  ;;  %v1674_v10 = vrot.slane %v1551_v8, %v2695_v57 }
 0xdab   :  { %v1678_v11 = vrot.slane %v1552_v9, %v2695_v57  ;;  %v1727_v12 = vsel %vm1726_vm12, %v1724_v37, %v1674_v10 }
 0xdad   :  { %v1728_v13 = vsel %vm1726_vm12, %v1725_v38, %v1678_v11 }
 0xe17   :  { %v1145_v14 = vpop.permute.xlu0 %1144 }
 0xe18   :  { %2101 = vmatmul.mubr.msk.bf16.vlgmr.msra.gmra.mrb[28].mxu0 %vm776_vm10, %v1145_v14 }
 0xe19   :  { %2113 = vmatpush3.bf16.msra.mxu0 %v2636_v48  ;;  %2116 = vmatprep.mubr.msk.bf16.mxu0 %vm2347_vm3, %v2346_v52 }
 0xe1a   :  { %2114 = vmatprep.subr.bf16.mxu0 %v2346_v52 }
 0xe1d   :  { %2115 = vmatpush3.bf16.msra.mxu0 %v2643_v49 }
 0xe1e   :  { %2128 = vmatprep.subr.bf16.mxu0 %v2346_v52 }
 0xeeb   :  { %v1183_v15 = vpop.f32.mrb[28].mxu0 }
 0xeec   :  { %v1189_v16 = vadd.f32 %v1183_v15, %v2668_v0  ;;  %v2102_v18 = vpop.f32.mrb[29].mxu0 }
 0xeed   :  { %v1186_v19 = vpop.f32.mrb[30].mxu0 }
 0xeee   :  { %2242 = vtanh.f32 %v1189_v16  ;;  %v2103_v20 = vpop.f32.mrb[31].mxu0  ;;  %v1934_v22 = vmul.f32 -1.442695, %v1189_v16 }
 0xef0   :  { %2244 = vpow2.f32 %v1934_v22 }
 0xef8   :  { %v2243_v21 = vpop.eup %2242 }
 0xef9   :  { %1202 = vrot.lane.b32.xlu1 %v2243_v21, %s2349_s19 }
 0xefa   :  { %v2245_v23 = vpop.eup %2244 }
 0xefb   :  { %v1193_v25 = vadd.f32 1.0, %v2245_v23 }
 0xefd   :  { %2246 = vrcp.f32 %v1193_v25 }
 0xf07   :  { %v2247_v26 = vpop.eup %2246 }
 0xf08   :  { %v1200_v30 = vmul.f32 %v2247_v26, %v1198_v29 }
 0xf6b   :  { %v1203_v27 = vpop.permute.xlu1 %1202 }
 0xf6c   :  { %v1205_v28 = vmul.f32 %v2247_v26, %v1203_v27 }
 0xf6e   :  { %1207 = vrot.lane.b32.xlu0 %v1205_v28, %s2350_s10 }
 0xfe0   :  { %v1208_v31 = vpop.permute.xlu0 %1207 }
 0xfe1   :  { %v1210_v32 = vadd.f32 %v1208_v31, %v1200_v30 }
 0xfe3   :  { %2248 = vtanh.f32 %v1210_v32 }
 0xfed   :  { %v2249_v17 = vpop.eup %2248 }
 0xfee   :  { %1213 = vrot.lane.b32.xlu1 %v2249_v17, %s2349_s19 }
0x1060   :  { %v1214_v33 = vpop.permute.xlu1 %1213 }
0x1061   :  { %v1216_v34 = vmul.f32 %v2247_v26, %v1214_v33 }
0x1063   :  { %v1217_v35 = vpack.c.bf16 %v1216_v34, %v1216_v34  ;;  %v1560_v36 = vrot.slane %v1216_v34, %v2677_v24 }
0x1065   :  { %v1561_v37 = vcombine.high %v1560_v36, %v1560_v36  ;;  %v1568_v38 = vrot.slane %v1560_v36, %v2677_v24  ;;  %1219 = vrot.lane.b32.xlu0 %v1217_v35, %s2350_s10 }
0x1067   :  { %v1575_v39 = vrot.slane %v1561_v37, %v2677_v24  ;;  %v1684_v40 = vrot.slane %v1568_v38, %v2695_v57 }
0x1069   :  { %v1688_v41 = vrot.slane %v1575_v39, %v2695_v57  ;;  %v1729_v42 = vsel %vm576_vm7, %v1727_v12, %v1684_v40 }
0x106b   :  { %v1730_v43 = vsel %vm576_vm7, %v1728_v13, %v1688_v41 }
0x10d7   :  { %v1220_v44 = vpop.permute.xlu0 %1219 }
0x10d8   :  { %2109 = vmatmul.mubr.msk.bf16.vlgmr.msra.gmra.mrb[16].mxu1 %vm776_vm10, %v1220_v44 }
0x10d9   :  { %2121 = vmatpush3.bf16.msra.mxu1 %v2636_v48  ;;  %2124 = vmatprep.mubr.msk.bf16.mxu1 %vm2347_vm3, %v2346_v52 }
0x10da   :  { %2122 = vmatprep.subr.bf16.mxu1 %v2346_v52 }
0x10dd   :  { %2123 = vmatpush3.bf16.msra.mxu1 %v2643_v49  ;;  %v1276_v49 = vrot.slane %v1210_v32, 6 }
0x11ab   :  { %v1258_v45 = vpop.f32.mrb[16].mxu1 }
0x11ac   :  { %v1265_v46 = vrot.slane %v1258_v45, 6  ;;  %v2110_v47 = vpop.f32.mrb[17].mxu1 }
0x11ad   :  { %v1261_v50 = vpop.f32.mrb[18].mxu1 }
0x11ae   :  { %v1267_v51 = vadd.f32 %v1265_v46, %v2668_v0  ;;  %v2111_v53 = vpop.f32.mrb[19].mxu1 }
0x11b0   :  { %2250 = vtanh.f32 %v1267_v51  ;;  %v1936_v55 = vmul.f32 -1.442695, %v1267_v51 }
0x11b2   :  { %2252 = vpow2.f32 %v1936_v55 }
0x11ba   :  { %v2251_v54 = vpop.eup %2250 }
0x11bb   :  { %1280 = vrot.lane.b32.xlu1 %v2251_v54, %s2349_s19 }
0x11bc   :  { %v2253_v48 = vpop.eup %2252 }
0x11bd   :  { %v1271_v56 = vadd.f32 1.0, %v2253_v48 }
0x11bf   :  { %2254 = vrcp.f32 %v1271_v56 }
0x11c9   :  { %v2255_v58 = vpop.eup %2254 }
0x11ca   :  { %v1278_v1 = vmul.f32 %v2255_v58, %v1276_v49 }
0x122d   :  { %v1281_v59 = vpop.permute.xlu1 %1280 }
0x122e   :  { %v1283_v60 = vmul.f32 %v2255_v58, %v1281_v59 }
0x1230   :  { %1285 = vrot.lane.b32.xlu0 %v1283_v60, %s2350_s10 }
0x12a2   :  { %v1286_v61 = vpop.permute.xlu0 %1285 }
0x12a3   :  { %v1288_v62 = vadd.f32 %v1286_v61, %v1278_v1 }
0x12a5   :  { %2256 = vtanh.f32 %v1288_v62  ;;  %v1355_v32 = vrot.slane %v1288_v62, 6 }
0x12af   :  { %v2257_v63 = vpop.eup %2256 }
0x12b0   :  { %1291 = vrot.lane.b32.xlu1 %v2257_v63, %s2349_s19 }
0x1322   :  { %v1292_v6 = vpop.permute.xlu1 %1291 }
0x1323   :  { %v1294_v2 = vmul.f32 %v2255_v58, %v1292_v6 }
0x1325   :  { %v1295_v3 = vpack.c.bf16 %v1294_v2, %v1294_v2  ;;  %v1583_v4 = vrot.slane %v1294_v2, %v2677_v24 }
0x1327   :  { %v1297_v5 = vrot.slane %v1295_v3, 1  ;;  %v1584_v7 = vcombine.high %v1583_v4, %v1583_v4  ;;  %v1591_v8 = vrot.slane %v1583_v4, %v2677_v24 }
0x1329   :  { %v1598_v9 = vrot.slane %v1584_v7, %v2677_v24  ;;  %v1599_v10 = vcombine.high %v1591_v8, %v1591_v8  ;;  %1298 = vrot.lane.b32.xlu0 %v1297_v5, %s2350_s10  ;;  %v2208_v5 = vld [vmem:[%s2860_s11] sm:$0xff]   ;;  %v2209_v7 = vld [vmem:[%s2860_s11 + $0x8] sm:$0xff]   ;;  %s2352_s11 = smov 96  }
0x132b   :  { %v1600_v11 = vcombine.high %v1598_v9, %v1598_v9  ;;  %v1694_v12 = vrot.slane %v1599_v10, %v2695_v57 }
0x132d   :  { %v1698_v13 = vrot.slane %v1600_v11, %v2695_v57  ;;  %v1731_v14 = vsel %vm105_vm0, %v1729_v42, %v1694_v12 }
0x132f   :  { %v1732_v15 = vsel %vm105_vm0, %v1730_v43, %v1698_v13 }
0x139b   :  { %v1299_v16 = vpop.permute.xlu0 %1298 }
0x139c   :  { %2117 = vmatmul.mubr.msk.bf16.vlgmr.msra.gmra.mrb[32].mxu0 %vm776_vm10, %v1299_v16 }
0x139d   :  { %2132 = vmatprep.mubr.msk.bf16.mxu0 %vm2347_vm3, %v2346_v52  ;;  %2129 = vmatpush3.bf16.msra.mxu0 %v2208_v5 }
0x139e   :  { %2130 = vmatprep.subr.bf16.mxu0 %v2346_v52 }
0x13a1   :  { %2131 = vmatpush3.bf16.msra.mxu0 %v2209_v7 }
0x146f   :  { %v1337_v18 = vpop.f32.mrb[32].mxu0 }
0x1470   :  { %v1344_v19 = vrot.slane %v1337_v18, 4  ;;  %v2118_v20 = vpop.f32.mrb[33].mxu0 }
0x1471   :  { %v1340_v21 = vpop.f32.mrb[34].mxu0 }
0x1472   :  { %v1346_v22 = vadd.f32 %v1344_v19, %v2668_v0  ;;  %v2119_v23 = vpop.f32.mrb[35].mxu0 }
0x1474   :  { %2258 = vtanh.f32 %v1346_v22  ;;  %v1938_v26 = vmul.f32 -1.442695, %v1346_v22 }
0x1476   :  { %2260 = vpow2.f32 %v1938_v26 }
0x147e   :  { %v2259_v25 = vpop.eup %2258 }
0x147f   :  { %1359 = vrot.lane.b32.xlu1 %v2259_v25, %s2349_s19 }
0x1480   :  { %v2261_v27 = vpop.eup %2260 }
0x1481   :  { %v1350_v28 = vadd.f32 1.0, %v2261_v27 }
0x1483   :  { %2262 = vrcp.f32 %v1350_v28 }
0x148d   :  { %v2263_v29 = vpop.eup %2262 }
0x148e   :  { %v1357_v17 = vmul.f32 %v2263_v29, %v1355_v32 }
0x14f1   :  { %v1360_v30 = vpop.permute.xlu1 %1359 }
0x14f2   :  { %v1362_v31 = vmul.f32 %v2263_v29, %v1360_v30 }
0x14f4   :  { %1364 = vrot.lane.b32.xlu0 %v1362_v31, %s2350_s10 }
0x1566   :  { %v1365_v33 = vpop.permute.xlu0 %1364 }
0x1567   :  { %v1367_v34 = vadd.f32 %v1365_v33, %v1357_v17 }
0x1569   :  { %2264 = vtanh.f32 %v1367_v34  ;;  %v1434_v6 = vrot.slane %v1367_v34, 6 }
0x1573   :  { %v2265_v35 = vpop.eup %2264 }
0x1574   :  { %1370 = vrot.lane.b32.xlu1 %v2265_v35, %s2349_s19 }
0x15e6   :  { %v1371_v36 = vpop.permute.xlu1 %1370 }
0x15e7   :  { %v1373_v37 = vmul.f32 %v2263_v29, %v1371_v36 }
0x15e9   :  { %v1374_v38 = vpack.c.bf16 %v1373_v37, %v1373_v37  ;;  %v1602_v39 = vcombine.high %v1373_v37, %v1373_v37 }
0x15eb   :  { %v1376_v40 = vrot.slane %v1374_v38, 2  ;;  %v1609_v41 = vrot.slane %v1602_v39, %v2677_v24 }
0x15ed   :  { %v1610_v42 = vcombine.high %v1609_v41, %v1609_v41  ;;  %v1617_v43 = vrot.slane %v1609_v41, %v2677_v24  ;;  %1377 = vrot.lane.b32.xlu0 %v1376_v40, %s2350_s10 }
0x15ef   :  { %v1624_v44 = vrot.slane %v1610_v42, %v2677_v24  ;;  %v1704_v45 = vrot.slane %v1617_v43, %v2695_v57 }
0x15f1   :  { %v1708_v46 = vrot.slane %v1624_v44, %v2695_v57  ;;  %v1733_v47 = vsel %vm106_vm1, %v1731_v14, %v1704_v45 }
0x15f3   :  { %v1734_v50 = vsel %vm106_vm1, %v1732_v15, %v1708_v46 }
0x165f   :  { %v1378_v51 = vpop.permute.xlu0 %1377 }
0x1660   :  { %2125 = vmatmul.mubr.msk.bf16.vlgmr.msra.gmra.mrb[20].mxu1 %vm776_vm10, %v1378_v51 }
0x1733   :  { %v1416_v53 = vpop.f32.mrb[20].mxu1 }
0x1734   :  { %v1423_v54 = vrot.slane %v1416_v53, 2  ;;  %v2126_v55 = vpop.f32.mrb[21].mxu1 }
0x1735   :  { %v1419_v48 = vpop.f32.mrb[22].mxu1 }
0x1736   :  { %v1425_v56 = vadd.f32 %v1423_v54, %v2668_v0  ;;  %v2127_v58 = vpop.f32.mrb[23].mxu1 }
0x1738   :  { %2266 = vtanh.f32 %v1425_v56  ;;  %v1940_v60 = vmul.f32 -1.442695, %v1425_v56 }
0x173a   :  { %2268 = vpow2.f32 %v1940_v60 }
0x1742   :  { %v2267_v59 = vpop.eup %2266 }
0x1743   :  { %1438 = vrot.lane.b32.xlu1 %v2267_v59, %s2349_s19 }
0x1744   :  { %v2269_v49 = vpop.eup %2268 }
0x1745   :  { %v1429_v1 = vadd.f32 1.0, %v2269_v49 }
0x1747   :  { %2270 = vrcp.f32 %v1429_v1 }
0x1751   :  { %v2271_v61 = vpop.eup %2270 }
0x1752   :  { %v1436_v2 = vmul.f32 %v2271_v61, %v1434_v6 }
0x17b5   :  { %v1439_v62 = vpop.permute.xlu1 %1438 }
0x17b6   :  { %v1441_v63 = vmul.f32 %v2271_v61, %v1439_v62 }
0x17b8   :  { %1443 = vrot.lane.b32.xlu0 %v1441_v63, %s2350_s10 }
0x182a   :  { %v1444_v3 = vpop.permute.xlu0 %1443 }
0x182b   :  { %v1446_v4 = vadd.f32 %v1444_v3, %v1436_v2 }
0x182d   :  { %2272 = vtanh.f32 %v1446_v4 }
0x1837   :  { %v2273_v0 = vpop.eup %2272 }
0x1838   :  { %1449 = vrot.lane.b32.xlu1 %v2273_v0, %s2349_s19 }
0x18aa   :  { %v1450_v8 = vpop.permute.xlu1 %1449 }
0x18ab   :  { %v1452_v9 = vmul.f32 %v2271_v61, %v1450_v8 }
0x18ad   :  { %v1626_v10 = vcombine.high %v1452_v9, %v1452_v9  ;;  %1811 = vrot.lane.b32.xlu1 %v1452_v9, %s2350_s10 }
0x18af   :  { %v1633_v11 = vrot.slane %v1626_v10, %v2677_v24 }
0x18b1   :  { %v1634_v12 = vcombine.high %v1633_v11, %v1633_v11  ;;  %v1641_v13 = vrot.slane %v1633_v11, %v2677_v24 }
0x18b3   :  { %v1648_v14 = vrot.slane %v1634_v12, %v2677_v24  ;;  %v1649_v15 = vcombine.high %v1641_v13, %v1641_v13 }
0x18b5   :  { %v1650_v16 = vcombine.high %v1648_v14, %v1648_v14  ;;  %v1714_v18 = vrot.slane %v1649_v15, %v2695_v57 }
0x18b7   :  { %v1718_v52 = vrot.slane %v1650_v16, %v2695_v57  ;;  %v1736_v19 = vsel %vm1735_vm13, %v1733_v47, %v1714_v18 }
0x18b9   :  { %v1737_v20 = vsel %vm1735_vm13, %v1734_v50, %v1718_v52 }
0x18ba   :  { %v1738_v21 = vpack.c.bf16 %v1737_v20, %v1736_v19 }
0x18bc   :  { %1751 = vrot.lane.b32.xlu0 %v1738_v21, %s2350_s10 }
0x18c0   :  { %1817 = vrot.lane.b32.xlu0 %v1446_v4, %s2352_s11 }
0x191f   :  { %v1812_v22 = vpop.permute.xlu1 %1811 }
0x1920   :  { %1815 = vst.msk [vmem:[#allocation4 - $0x6] sm:$0xc0] %vm1814_vm14, %v1812_v22 }
0x192e   :  { %v1752_v23 = vpop.permute.xlu0 %1751 }
0x192f   :  { %2133 = vmatmul.mubr.msk.bf16.vlgmr.msra.gmra.mrb[36].mxu0 %vm776_vm10, %v1752_v23 }
0x1932   :  { %v1818_v24 = vpop.permute.xlu0 %1817 }
0x1933   :  { %1820 = vst.msk [vmem:[#allocation6 - $0x6] sm:$0xc0] %vm1814_vm14, %v1818_v24 }
0x1934   :  { %2285 = shalt.err (!%p2282_p4)
}
0x1935   :  { %s2286_s27 = scalar_lea.hbm %s2863_s14, 32 }
0x1936   :  { %p2287_p5 = scmp.ne.s32.totalorder %s2863_s14, %s2286_s27  ;;  %p2290_p6 = scmp.lt.u32.totalorder %s2286_s27, %s2863_s14 }
0x1938   :  { %p2292_p7 = pnand %p2290_p6, %p2287_p5 }
0x193a   :  { %2295 = shalt.err (!%p2292_p7)
}
0x193b   :  { %1842 = dma.vmem_to_hbm [thread:$0]  %s1840_s1, 32, %s2863_s14, [#allocation5]  }
0x193c   :  { %s2354_s4 = smov [#allocation6]  }
0x193d   :  { %s1849_s30 = sshll.u32 %s2354_s4, 4  ;;  %s1850_s30 = int_to_ptr.vmem [resolvable:$true] %s1849_s30 }
0x193e   :  { %s2296_s16 = scalar_lea.vmem %s1850_s30, 32  ;;  %p2301_p9 = scmp.lt.s32.totalorder %s1850_s30, %s1850_s30 }
0x193f   :  { %p2297_p8 = scmp.ne.s32.totalorder %s1850_s30, %s2296_s16  ;;  %p2302_p10 = scmp.lt.s32.totalorder %s2296_s16, %s2296_s16 }
0x1941   :  { %p2303_p11 = por %p2302_p10, %p2301_p9 }
0x1943   :  { %p2304_p12 = pnand %p2303_p11, %p2297_p8 }
0x1945   :  { %2307 = shalt.err (!%p2304_p12)
}
0x1946   :  { %s2308_s18 = scalar_lea.hbm %s2864_s15, 32 }
0x1947   :  { %p2309_p13 = scmp.ne.s32.totalorder %s2864_s15, %s2308_s18  ;;  %p2312_p0 = scmp.lt.u32.totalorder %s2308_s18, %s2864_s15 }
0x1949   :  { %p2314_p1 = pnand %p2312_p0, %p2309_p13 }
0x194b   :  { %2317 = shalt.err (!%p2314_p1)
}
0x194c   :  { %1852 = dma.vmem_to_hbm [thread:$0]  %s1850_s30, 32, %s2864_s15, [#allocation5]   ;;  %v1941_v57 = vld [vmem:[%s2861_s12] ss:$0 sm:$0xff] }
0x194d   :  { %s2355_s23 = smov [#allocation2]  }
0x194e   :  { %s1826_s11 = sshll.u32 %s2355_s23, 4  ;;  %s1827_s11 = int_to_ptr.vmem [resolvable:$true] %s1826_s11 }
0x194f   :  { %s2318_s24 = scalar_lea.vmem %s1827_s11, 256  ;;  %p2323_p3 = scmp.lt.s32.totalorder %s1827_s11, %s1827_s11 }
0x1950   :  { %p2319_p2 = scmp.ne.s32.totalorder %s1827_s11, %s2318_s24  ;;  %p2324_p4 = scmp.lt.s32.totalorder %s2318_s24, %s2318_s24 }
0x1952   :  { %p2325_p5 = por %p2324_p4, %p2323_p3 }
0x1954   :  { %p2326_p6 = pnand %p2325_p5, %p2319_p2 }
0x1a02   :  { %v1802_v25 = vpop.f32.mrb[36].mxu0 }
0x1a03   :  { %v1803_v26 = vadd.f32 %v1941_v57, %v1802_v25  ;;  %v2134_v27 = vpop.f32.mrb[37].mxu0 }
0x1a04   :  { %v1805_v28 = vpop.f32.mrb[38].mxu0 }
0x1a05   :  { %1809 = vst [vmem:[#allocation2] sm:$0xff] %v1803_v26  ;;  %v1806_v29 = vadd.f32 %v1941_v57, %v1805_v28  ;;  %v2135_v30 = vpop.f32.mrb[39].mxu0 }
0x1a07   :  { %1810 = vst [vmem:[#allocation2 + $0x8] sm:$0xff] %v1806_v29 }
0x1a08   :  { %2329 = shalt.err (!%p2326_p6)
}
0x1a09   :  { %s2330_s1 = scalar_lea.hbm %s2862_s13, 256 }
0x1a0a   :  { %p2331_p7 = scmp.ne.s32.totalorder %s2862_s13, %s2330_s1  ;;  %p2334_p8 = scmp.lt.u32.totalorder %s2330_s1, %s2862_s13 }
0x1a0c   :  { %p2336_p9 = pnand %p2334_p8, %p2331_p7 }
0x1a0e   :  { %2339 = shalt.err (!%p2336_p9)
}
0x1a0f   :  { %s2356_s28 = smov 128   ;;  %s2357_s2 = smov 8  }
0x1a10   :  { %1832 = dma.vmem_to_hbm [thread:$0]  %s1827_s11, 256, %s2862_s13, [#allocation3], %s2356_s28, %s2356_s28, %s2357_s2  }
0x1a11   :  { %2340 = dma.done.wait [#allocation3], 256  }
0x1a12   :  { %2341 = vsyncadd [#allocation3], 4294967040 }
0x1a13   :  { %2342 = dma.done.wait [#allocation5], 64  }
0x1a14   :  { %2343 = vsyncadd [#allocation5], 4294967232 }
0x1a15   :  { %1862 = vsyncpa [#allocation3], 1 }
0x1a16   :  { %1863 = vsyncpa [#allocation5], 1 }

</bundles_post_ra>
